<compile_context>
chip_gen: v7x
topology: tpu7x:2x2x1
jax: 0.10.0
libtpu: 0.0.40
codegen_flags: <defaults>
</compile_context>

<pallas_src>
import functools

import jax
import jax.numpy as jnp
from jax.experimental import pallas as pl
from jax.experimental.pallas import tpu as pltpu

_MiB = 1024 * 1024
_FAST_PATH_BYTES = 2 * _MiB   # below this, plain XLA multiply (fused) wins
_MAX_TF = 4096                # feature-tile lane cap (multiple of 128)


def _scaling_kernel(x_ref, s_ref, o_ref):
    # (tb, tf) tile * (1, tf) scale row, sublane-broadcast on the VPU.
    # jnp promotion inside the multiply matches torch (e.g. bf16 * f32 -> f32).
    o_ref[...] = (x_ref[...] * s_ref[...]).astype(o_ref.dtype)


def _sublane_multiple(itemsize: int) -> int:
    # f32 packs 8 rows per vreg, bf16 16, int8/fp8 32.
    return {4: 8, 2: 16, 1: 32}.get(itemsize, 8)


def _round_up(x: int, m: int) -> int:
    return ((x + m - 1) // m) * m


def _round_down(x: int, m: int) -> int:
    return max(m, (x // m) * m)


@functools.lru_cache(maxsize=1)
def _tpu_config() -> tuple[int, bool, int]:
    """Returns (tile_target_bytes, force_multi_step, vmem_phys_bytes)."""
    vmem_phys = 64 * _MiB  # conservative default (v7x-class)
    try:
        info = pltpu.get_tpu_info()
        cap = getattr(info, "vmem_capacity_bytes", None)
        if cap:
            vmem_phys = int(cap)
    except Exception:
        pass
    if vmem_phys <= 64 * _MiB:
        # v7x: 64 MiB VMEM per TC, 2 TensorCores -> smaller tiles, force >= 2 grid steps.
        return 4 * _MiB, True, vmem_phys
    # v5e / v6e: 128 MiB VMEM, 1 TensorCore -> bigger tiles amortize per-step overhead.
    return 8 * _MiB, False, vmem_phys


def _pick_tiles(B: int, F: int, bytes_per_elem: int, sub: int,
                tile_target_bytes: int, force_multi_step: bool) -> tuple[int, int]:
    # Feature tile: full width if modest, otherwise a lane-dense 128-multiple slab.
    tf = F if F <= _MAX_TF else _MAX_TF
    # Batch tile purely from the byte budget (input + output residency per element).
    tb = tile_target_bytes // max(1, tf * bytes_per_elem)
    tb = _round_down(tb, sub)
    tb = max(sub, min(tb, _round_up(B, sub)))
    if force_multi_step:
        # v7x: guarantee >= 2 grid steps along a parallel axis so both TCs get work.
        while pl.cdiv(F, tf) * pl.cdiv(B, tb) < 2 and tb > sub:
            tb = max(sub, _round_down(tb // 2, sub))
    return tb, tf


def scaling_layer(x: jax.Array, scale: jax.Array, *,
                  tb: int | None = None, tf: int | None = None,
                  donate_x: bool = False) -> jax.Array:
    """Pallas TPU ScalingLayer.forward: x * scale[None, :] for x of shape (B, F)."""
    B, F = x.shape
    assert scale.shape == (F,), f"scale shape {scale.shape} != ({F},)"

    # Torch-style type promotion: compute & return in the promoted dtype
    # (no narrowing of a wider scale, no double rounding).
    out_dtype = jnp.promote_types(x.dtype, scale.dtype)
    x_item = jnp.dtype(x.dtype).itemsize
    s_item = jnp.dtype(scale.dtype).itemsize
    o_item = jnp.dtype(out_dtype).itemsize

    # Fast path: small inputs (launch + per-step overhead dominates, and the
    # pallas_call boundary blocks XLA fusion) or feature width below one lane group
    # (would lower to masked vst.msk partial stores).
    if B * F * x_item < _FAST_PATH_BYTES or F < 128:
        return (x * scale[None, :]).astype(out_dtype)

    tile_target, force_multi, vmem_phys = _tpu_config()
    sub = _sublane_multiple(min(x_item, o_item))  # tightest sublane constraint
    auto_tb, auto_tf = _pick_tiles(B, F, x_item + o_item, sub, tile_target, force_multi)
    tb = auto_tb if tb is None else tb
    tf = auto_tf if tf is None else tf

    # Residency-derived VMEM limit: 2x (in + out) tiles + 2x scale row + 4 MiB slack,
    # floored at 16 MiB and capped at 3/4 of physical VMEM for this generation.
    per_step = tb * tf * (x_item + o_item) + tf * s_item
    vmem_limit = max(16 * _MiB, 2 * per_step + 4 * _MiB)
    vmem_limit = min(vmem_limit, (3 * vmem_phys) // 4)

    n_b, n_f = pl.cdiv(B, tb), pl.cdiv(F, tf)
    scale2d = scale.reshape(1, F)

    extra_kwargs = {}
    if donate_x and out_dtype == x.dtype:
        # Buffer is actually reused only if the caller also donates x at the jit
        # boundary and never reads x afterwards; otherwise XLA inserts a copy.
        extra_kwargs["input_output_aliases"] = {0: 0}

    # Feature axis is the OUTER grid dim: the scale block index depends only on it,
    # so Pallas keeps the (1, tf) scale row resident across the inner batch loop.
    return pl.pallas_call(
        _scaling_kernel,
        out_shape=jax.ShapeDtypeStruct((B, F), out_dtype),
        grid_spec=pltpu.PrefetchScalarGridSpec(
            num_scalar_prefetch=0,
            grid=(n_f, n_b),
            in_specs=[
                pl.BlockSpec((tb, tf), lambda j, i: (i, j)),
                pl.BlockSpec((1, tf), lambda j, i: (0, j)),
            ],
            out_specs=pl.BlockSpec((tb, tf), lambda j, i: (i, j)),
        ),
        compiler_params=pltpu.CompilerParams(
            dimension_semantics=("parallel", "parallel"),
            vmem_limit_bytes=int(vmem_limit),
        ),
        **extra_kwargs,
    )(x, scale2d)


if __name__ == "__main__":
    key = jax.random.PRNGKey(0)
    k1, k2, k3, k4, k5 = jax.random.split(key, 5)

    # 1) Tiny shape consistent with the module spec (batch=8, n_features=32): fast path.
    xs = jax.random.normal(k1, (8, 32), dtype=jnp.float32)
    ss = jnp.ones((32,), dtype=jnp.float32)  # PyTorch init: torch.ones(n_features)
    outs = scaling_layer(xs, ss)
    jax.block_until_ready(outs)
    assert outs.shape == (8, 32)
    assert jnp.allclose(outs, xs * ss[None, :], atol=1e-6), "mismatch (fast path)"

    # 2) Pallas path: 4 MiB f32 input with non-trivial scale.
    B, F = 1024, 1024
    x = jax.random.normal(k2, (B, F), dtype=jnp.float32)
    scale = jax.random.normal(k3, (F,), dtype=jnp.float32)
    out = scaling_layer(x, scale)
    jax.block_until_ready(out)
    assert out.shape == (B, F) and out.dtype == jnp.float32
    assert jnp.allclose(out, x * scale[None, :], atol=1e-6), "mismatch (pallas path)"

    # 3) Ragged batch + forced small tb -> multi-step grid with a partial last batch tile.
    B2, F2 = 1000, 768
    x2 = jax.random.normal(k4, (B2, F2), dtype=jnp.float32)
    scale2 = jax.random.normal(k5, (F2,), dtype=jnp.float32)
    out2 = scaling_layer(x2, scale2, tb=128)
    jax.block_until_ready(out2)
    assert jnp.allclose(out2, x2 * scale2[None, :], atol=1e-6), "mismatch (ragged)"

    # 4) Mixed precision: bf16 x with f32 scale -> f32 output (torch-style promotion),
    #    exercised through the Pallas path.
    B3, F3 = 2048, 1024
    x3 = jax.random.normal(k2, (B3, F3), dtype=jnp.bfloat16)
    scale3 = jax.random.normal(k3, (F3,), dtype=jnp.float32)
    out3 = scaling_layer(x3, scale3)
    jax.block_until_ready(out3)
    assert out3.dtype == jnp.float32
    ref3 = x3.astype(jnp.float32) * scale3[None, :]
    assert jnp.allclose(out3, ref3, atol=1e-6), "mismatch (mixed precision)"

    print("KERNEL_OK")
</pallas_src>

<mosaic_0001>
module attributes {stable_mosaic.version = 11 : i64} {
  func.func @_scaling_kernel(%arg0: i32, %arg1: i32, %arg2: memref<512x1024xf32, #tpu.memory_space<vmem>>, %arg3: memref<1x1024xf32, #tpu.memory_space<vmem>>, %arg4: memref<512x1024xf32, #tpu.memory_space<vmem>>) attributes {dimension_semantics = [#tpu.dimension_semantics<parallel>, #tpu.dimension_semantics<parallel>], iteration_bounds = array<i64: 1, 2>, scalar_prefetch = 0 : i64, scratch_operands = 0 : i64, tpu.core_type = #tpu.core_type<tc>, window_params = [{transform_indices = @transform_0, window_bounds = array<i64: 512, 1024>}, {transform_indices = @transform_1, window_bounds = array<i64: 1, 1024>}, {transform_indices = @transform_2, window_bounds = array<i64: 512, 1024>}]} {
    %c0 = arith.constant 0 : index
    %c0_0 = arith.constant 0 : index
    %0 = vector.load %arg2[%c0, %c0_0] : memref<512x1024xf32, #tpu.memory_space<vmem>>, vector<512x1024xf32>
    %c0_1 = arith.constant 0 : index
    %c0_2 = arith.constant 0 : index
    %1 = vector.load %arg3[%c0_1, %c0_2] : memref<1x1024xf32, #tpu.memory_space<vmem>>, vector<1x1024xf32>
    %2 = vector.broadcast %1 : vector<1x1024xf32> to vector<512x1024xf32>
    %3 = arith.mulf %0, %2 : vector<512x1024xf32>
    %c0_3 = arith.constant 0 : index
    %c0_4 = arith.constant 0 : index
    %4 = vector.load %arg4[%c0_3, %c0_4] : memref<512x1024xf32, #tpu.memory_space<vmem>>, vector<512x1024xf32>
    tpu.vector_store %arg4[%c0_3, %c0_4], %3 {strides = array<i32>} : memref<512x1024xf32, #tpu.memory_space<vmem>>, vector<512x1024xf32>,
    return
  }
  func.func @transform_0(%arg0: i32, %arg1: i32) -> (i32, i32) {
    %c0_i32 = arith.constant 0 : i32
    return %arg1, %arg0 : i32, i32
  }
  func.func @transform_1(%arg0: i32, %arg1: i32) -> (i32, i32) {
    %c0_i32 = arith.constant 0 : i32
    %c0_i32_0 = arith.constant 0 : i32
    return %c0_i32, %arg0 : i32, i32
  }
  func.func @transform_2(%arg0: i32, %arg1: i32) -> (i32, i32) {
    %c0_i32 = arith.constant 0 : i32
    return %arg1, %arg0 : i32, i32
  }
}

</mosaic_0001>

<bundles_post_ra>
// kernel: tpu_custom_call.1
= control target key start
LH: loop header
LB: loop body
LE: loop exit
PB: predicated region body
PF: predicated region fallthrough
CT: control target
= control target key end

     0   :  { %7 = vsyncpa [#allocation3], 0  ;;  %s3955_s0 = inlined_call_operand.hbm [shape: f32[1024,1024], index: 0, kind: input, shape index: {}]   ;;  %s3956_s1 = inlined_call_operand.hbm [shape: f32[1,1024], index: 1, kind: input, shape index: {}]   ;;  %s3957_s2 = inlined_call_operand.hbm [shape: f32[1024,1024], index: 2, kind: output, shape index: {}]  }
   0x1   :  { %9 = vsyncpa [#allocation3 + $0x1], 0 }
   0x2   :  { %10 = vsyncpa [#allocation6], 0 }
   0x3   :  { %11 = vsyncpa [#allocation4], 0 }
   0x4   :  { %13 = vsyncpa [#allocation4 + $0x1], 0  ;;  %s2169_s9 = smov 0   ;;  %s2171_s10 = smov 0  }
   0x5   :  { %s2173_s11 = smov 0   ;;  %s2175_s12 = smov 0  }
   0x6   :  { %s2177_s13 = smov 0   ;;  %s2179_s14 = smov 0  }
   0x7 LB: > { %s1901_s15 = sadd.s32 4294967295, %s2145_s14   ;;  %s1902_s16 = sadd.s32 4294967294, %s2145_s14   ;;  %s2145_s14 = sphi %s2179_s14, %s19_s14   ;;  %s2141_s13 = sphi %s2177_s13, %s3985_s13   ;;  %s2137_s12 = sphi %s2175_s12, %s3984_s12   ;;  %s2133_s11 = sphi %s2173_s11, %s3983_s11   ;;  %s2129_s10 = sphi %s2171_s10, %s3982_s10   ;;  %s2125_s9 = sphi %s2169_s9, %s3981_s9  }
   0x8   : > { %s40_s17 = sadd.s32 1, %s2133_s11  ;;  %p47_p0 = scmp.ne.s32.totalorder %s2133_s11, %s2129_s10 }
   0x9   : > { %p48_p1 = scmp.eq.s32.totalorder %s2145_s14, 0  ;;  %p53_p2 = scmp.ne.s32.totalorder %s2129_s10, %s2125_s9 }
   0xa   : > { %p2207_p3 = scmp.eq.s32.totalorder %s1901_s15, 0  ;;  %p105_p4 = scmp.eq.s32.totalorder %s1901_s15, 1 }
   0xb   : > { %p2211_p5 = por %p48_p1, %p47_p0  ;;  %p111_p6 = scmp.eq.s32.totalorder %s1902_s16, 1 }
   0xc   : > { %s3964_s18 = scalar_select %p2207_p3, 1, 0 }
   0xd   : > { %p2217_p7 = por %p2207_p3, %p53_p2  ;;  %p2221_p8 = por %p105_p4, %p47_p0 }
   0xe   : > { %p2225_p9 = por %p111_p6, %p53_p2  ;;  %p1903_p10 = scmp.ge.s32.totalorder %s2145_s14, 1 }
   0xf   : > { %s3966_s20 = scalar_select %p2217_p7, 1, 0 }
  0x10   : > { %s3967_s21 = scalar_select %p2221_p8, 1, 0 }
  0x11   : > { %s3968_s22 = scalar_select %p2225_p9, 1, 0 }
  0x12   : > { %p118_p11 = scmp.lt.s32.totalorder %s2145_s14, 3  ;;  %s2147_s24 = smov [#allocation5]  }
  0x13   : > { %s134_s25 = sshll.u32 %s2147_s24, 4  ;;  %p1945_p1 = scmp.lt.s32.totalorder %s2145_s14, 2  ;;  %s135_s25 = int_to_ptr.vmem [resolvable:$true] %s134_s25 }
  0x14   : > { %p2232_p13 = pnand %p1903_p10, %p118_p11  ;;  %s28_s28 = sadd.s32 1, %s2141_s13 }
  0x15   : > { %p2241_p4 = pnand %p1945_p1, %p2211_p5  ;;  %p2252_p6 = scmp.ge.s32.totalorder %s28_s28, 2 }
  0x16   : > { %s3969_s23 = scalar_select %p2232_p13, 1, 0 }
  0x17   : > { %p1932_p0 = pneg %p2232_p13  ;;  %s145_s30 = sand.u32 1, %s2133_s11  }
  0x18   : > { %s3970_s26 = scalar_select %p2241_p4, 1, 0 }
  0x19   : > { %p2247_p2 = pnand %p1932_p0, %p2207_p3  ;;  %s2001_s5 = scalar_lea.hbm %s3956_s1, 128 }
  0x1a   : > { %s3972_s29 = scalar_select %p2252_p6, 1, 0 }
  0x1b   : > { %p2002_p5 = scmp.ne.s32.totalorder %s3956_s1, %s2001_s5  ;;  %p2003_p10 = pneg %p2247_p2 }
  0x1c   : > { %p2008_p0 = scmp.lt.u32.totalorder %s2001_s5, %s3956_s1 }
  0x1d   : > { %p2004_p11 = pnand %p2003_p10, %p2002_p5 }
  0x1f   : > { %p2005_p1 = pneg %p2004_p11 }
  0x21   : > { %p2010_p12 = pnand %p2008_p0, %p2005_p1 }
  0x23   : > { %2013 = shalt.err (!%p2010_p12)
}
  0x24   : > { %s2014_s16 = scalar_lea.vmem %s135_s25, 128  ;;  %p2022_p7 = scmp.lt.s32.totalorder %s135_s25, %s135_s25 }
  0x25   : > { %p2015_p9 = scmp.ne.s32.totalorder %s135_s25, %s2014_s16  ;;  %p2023_p13 = scmp.lt.s32.totalorder %s2014_s16, %s2014_s16 }
  0x27   : > { %p2017_p8 = pnand %p2015_p9, %p2003_p10  ;;  %p2024_p4 = por %p2023_p13, %p2022_p7 }
  0x29   : > { %p2018_p3 = pneg %p2017_p8 }
  0x2b   : > { %p2025_p6 = pnand %p2024_p4, %p2018_p3 }
  0x2d   : > { %2028 = shalt.err (!%p2025_p6)
}
  0x2e   : > { %1935 = dma.hbm_to_vmem [thread:$0]  (!%p2247_p2), %s3956_s1, 128, %s135_s25, [#allocation6]  }
  0x2f   : > { %p3973_p9 = scmp.ne.s32.totalorder %s3972_s29, 0  ;;  %s1906_s3 = sshll.u32 %s145_s30, 12 }
  0x30   : > { %s1921_s5 = sshll.u32 %s2141_s13, 16  ;;  %s149_s8 = scalar_lea.vmem [#allocation2], %s1906_s3 }
  0x31   : > { %s3987_s28 = smov (%p3973_p9, %s28_s28), 0  ;;  %s2283_s7 = scalar_lea.hbm %s3955_s0, %s1921_s5 }
  0x32   : > { %s35_s4 = ssub.s32 %s2141_s13, %s3987_s28  ;;  %s159_s15 = sshll.u32 %s149_s8, 4  ;;  %s2290_s15 = int_to_ptr.vmem [resolvable:$true] %s159_s15 }
  0x33   : > { %p38_p3 = scmp.eq.s32.totalorder %s35_s4, 0  ;;  %s2292_s29 = scalar_lea.sflag [#allocation3], %s145_s30 }
  0x34   : > { %s2029_s16 = scalar_lea.hbm %s2283_s7, 65536  ;;  %p3974_p8 = scmp.ne.s32.totalorder %s3970_s26, 0 }
  0x35   : > { %s2288_s25 = scalar_select %p38_p3, %s2133_s11, %s40_s17  }
  0x36   : > { %p2030_p7 = scmp.ne.s32.totalorder %s2283_s7, %s2029_s16  ;;  %p2031_p12 = pneg %p3974_p8 }
  0x37   : > { %s2034_s3 = scalar_lea.hbm %s3955_s0, 131072  ;;  %p2035_p2 = scmp.lt.u32.totalorder %s2283_s7, %s3955_s0 }
  0x38   : > { %p2032_p13 = pnand %p2031_p12, %p2030_p7  ;;  %p2036_p6 = scmp.lt.u32.totalorder %s2034_s3, %s2029_s16 }
  0x39   : > { %p2038_p10 = scmp.lt.u32.totalorder %s2029_s16, %s2283_s7 }
  0x3a   : > { %p2033_p4 = pneg %p2032_p13  ;;  %p2037_p5 = por %p2036_p6, %p2035_p2 }
  0x3c   : > { %p2039_p11 = por %p2038_p10, %p2037_p5 }
  0x3e   : > { %p2040_p1 = pnand %p2039_p11, %p2033_p4 }
  0x40   : > { %2043 = shalt.err (!%p2040_p1)
}
  0x41   : > { %s2044_s17 = scalar_lea.vmem %s2290_s15, 65536  ;;  %s2148_s30 = smov [#allocation2]  }
  0x42   : > { %p2045_p0 = scmp.ne.s32.totalorder %s2290_s15, %s2044_s17  ;;  %s2049_s27 = sshll.u32 %s2148_s30, 4  ;;  %s2050_s27 = int_to_ptr.vmem [resolvable:$false] %s2049_s27 }
  0x43   : > { %s2051_s6 = scalar_lea.vmem %s2050_s27, 131072  ;;  %p2052_p7 = scmp.lt.s32.totalorder %s2290_s15, %s2050_s27 }
  0x44   : > { %p2047_p9 = pnand %p2045_p0, %p2031_p12  ;;  %p2053_p13 = scmp.lt.s32.totalorder %s2051_s6, %s2044_s17 }
  0x46   : > { %p2048_p3 = pneg %p2047_p9  ;;  %p2054_p2 = por %p2053_p13, %p2052_p7 }
  0x48   : > { %p2055_p6 = pnand %p2054_p2, %p2048_p3 }
  0x4a   : > { %2058 = shalt.err (!%p2055_p6)
}
  0x4b   : > { %s2149_s8 = smov 1024   ;;  %s2150_s16 = smov 64  }
  0x4c   : > { %1939 = dma.hbm_to_vmem [thread:$0]  (!%p3974_p8), %s2283_s7, 65536, %s2290_s15, %s2292_s29, %s2149_s8, %s2149_s8, %s2150_s16  }
  0x4d   : > { %p3975_p12 = scmp.ne.s32.totalorder %s3969_s23, 0 }
  0x4e   : > { %s2323_s19 = sand.u32 (!%p3975_p12), 1, %s2129_s10   ;;  %p3976_p4 = scmp.ne.s32.totalorder (!%p3975_p12), %s3966_s20, 0 }
  0x4f   : > { %171 = sbr.rel (%p3975_p12) target bundleno = 370 (0x172), region = 28  ;;  %s1911_s24 = sshll.u32 (!%p3975_p12), %s2323_s19, 12 }
  0x50   : > { %s174_s3 = scalar_lea.sflag (!%p3975_p12), [#allocation3], %s2323_s19  ;;  %s2329_s4 = scalar_lea.vmem (!%p3975_p12), [#allocation2], %s1911_s24 }
  0x56   : > { %2112 = dma.done.wait (%p3976_p4), %s174_s3, 65536  }
  0x57   : > { %2114 = vsyncadd (%p3976_p4), %s174_s3, 4294901760  ;;  %p3977_p8 = scmp.ne.s32.totalorder %s3964_s18, 0 }
  0x59   : > { %2116 = dma.done.wait (%p3977_p8), [#allocation6], 128  }
  0x5a   : > { %2118 = vsyncadd (%p3977_p8), [#allocation6], 4294967168  ;;  %v721_v0 = vlaneseq  ;;  %v207_v10 = vld [vmem:[%s2329_s4] sm:$0xff]  ;;  %v208_v12 = vld [vmem:[%s2329_s4 + $0x8] sm:$0xff]  ;;  %s2379_s18 = scalar_lea.vmem [#allocation7], %s1911_s24  ;;  %s1923_s20 = sshll.u32 %s2137_s12, 16 }
  0x5b   : > { %v719_v11 = vld [vmem:[#allocation5] sm:$0xff]  ;;  %v209_v15 = vld [vmem:[%s2329_s4 + $0x10] sm:$0xff]  ;;  %v210_v17 = vld [vmem:[%s2329_s4 + $0x18] sm:$0xff]  ;;  %s1802_s23 = sshll.u32 %s2379_s18, 4  ;;  %s3890_s15 = scalar_lea.hbm %s3957_s2, %s1923_s20  ;;  %s3894_s23 = int_to_ptr.vmem [resolvable:$true] %s1802_s23 }
  0x5c   : > { %v722_v1 = vshrl.u32 %v721_v0, 7  ;;  %v211_v19 = vld [vmem:[%s2329_s4 + $0x20] sm:$0xff]  ;;  %v212_v21 = vld [vmem:[%s2329_s4 + $0x28] sm:$0xff]  ;;  %v213_v23 = vld [vmem:[%s2329_s4 + $0x30] sm:$0xff]  ;;  %s1786_s12 = scalar_lea.sflag [#allocation4], %s2323_s19  ;;  %s2059_s29 = scalar_lea.vmem %s3894_s23, 65536 }
  0x5d   : > { %v214_v25 = vld [vmem:[%s2329_s4 + $0x38] sm:$0xff]  ;;  %v215_v31 = vld [vmem:[%s2329_s4 + $0x40] sm:$0xff]  ;;  %v216_v32 = vld [vmem:[%s2329_s4 + $0x48] sm:$0xff]  ;;  %p2060_p5 = scmp.ne.s32.totalorder %s3894_s23, %s2059_s29  ;;  %p3978_p10 = scmp.ne.s32.totalorder %s3967_s21, 0 }
  0x5e   : > { %v723_v2 = vsub.s32 0, %v722_v1  ;;  %v727_v3 = vsub.s32 1, %v722_v1  ;;  %v731_v4 = vsub.s32 2, %v722_v1  ;;  %v735_v5 = vsub.s32 3, %v722_v1  ;;  %v217_v33 = vld [vmem:[%s2329_s4 + $0x50] sm:$0xff]  ;;  %v218_v38 = vld [vmem:[%s2329_s4 + $0x58] sm:$0xff] }
  0x5f   : > { %v739_v6 = vsub.s32 4, %v722_v1  ;;  %v743_v7 = vsub.s32 5, %v722_v1  ;;  %v747_v8 = vsub.s32 6, %v722_v1  ;;  %v751_v9 = vsub.s32 7, %v722_v1  ;;  %v219_v39 = vld [vmem:[%s2329_s4 + $0x60] sm:$0xff]  ;;  %v220_v40 = vld [vmem:[%s2329_s4 + $0x68] sm:$0xff]  ;;  %p2061_p11 = pnand %p2060_p5, %p3978_p10 }
  0x60   : > { %v2341_v13 = vrot.slane %v719_v11, %v723_v2  ;;  %v2343_v14 = vrot.slane %v719_v11, %v727_v3  ;;  %v2346_v16 = vrot.slane %v719_v11, %v731_v4  ;;  %v2349_v18 = vrot.slane %v719_v11, %v735_v5  ;;  %v221_v45 = vld [vmem:[%s2329_s4 + $0x70] sm:$0xff]  ;;  %v222_v46 = vld [vmem:[%s2329_s4 + $0x78] sm:$0xff]  ;;  %v223_v47 = vld [vmem:[%s2329_s4 + $0x80] sm:$0xff]  ;;  %s2151_s5 = smov [#allocation7]  }
  0x61   : > { %v2352_v20 = vrot.slane %v719_v11, %v739_v6  ;;  %v2355_v22 = vrot.slane %v719_v11, %v743_v7  ;;  %v2358_v24 = vrot.slane %v719_v11, %v747_v8  ;;  %v2361_v26 = vrot.slane %v719_v11, %v751_v9  ;;  %v224_v52 = vld [vmem:[%s2329_s4 + $0x88] sm:$0xff]  ;;  %v225_v53 = vld [vmem:[%s2329_s4 + $0x90] sm:$0xff]  ;;  %v226_v54 = vld [vmem:[%s2329_s4 + $0x98] sm:$0xff]  ;;  %p2062_p1 = pneg %p2061_p11  ;;  %s2063_s17 = sshll.u32 %s2151_s5, 4  ;;  %s2064_s17 = int_to_ptr.vmem [resolvable:$false] %s2063_s17 }
  0x62   : > { %v761_v27 = vmul.f32 %v2341_v13, %v207_v10  ;;  %v762_v28 = vmul.f32 %v2343_v14, %v208_v12  ;;  %v763_v29 = vmul.f32 %v2346_v16, %v209_v15  ;;  %v764_v30 = vmul.f32 %v2349_v18, %v210_v17  ;;  %v227_v59 = vld [vmem:[%s2329_s4 + $0xa0] sm:$0xff]  ;;  %v228_v60 = vld [vmem:[%s2329_s4 + $0xa8] sm:$0xff]  ;;  %v229_v61 = vld [vmem:[%s2329_s4 + $0xb0] sm:$0xff]  ;;  %s2065_s30 = scalar_lea.vmem %s2064_s17, 131072  ;;  %p2066_p0 = scmp.lt.s32.totalorder %s3894_s23, %s2064_s17 }
  0x63   : > { %v765_v34 = vmul.f32 %v2352_v20, %v211_v19  ;;  %v766_v35 = vmul.f32 %v2355_v22, %v212_v21  ;;  %v767_v36 = vmul.f32 %v2358_v24, %v213_v23  ;;  %v768_v37 = vmul.f32 %v2361_v26, %v214_v25  ;;  %v230_v1 = vld [vmem:[%s2329_s4 + $0xb8] sm:$0xff]  ;;  %v231_v2 = vld [vmem:[%s2329_s4 + $0xc0] sm:$0xff]  ;;  %v232_v3 = vld [vmem:[%s2329_s4 + $0xc8] sm:$0xff]  ;;  %p2067_p9 = scmp.lt.s32.totalorder %s2065_s30, %s2059_s29 }
  0x64   : > { %1273 = vst [vmem:[%s2379_s18] sm:$0xff] %v761_v27  ;;  %1274 = vst [vmem:[%s2379_s18 + $0x8] sm:$0xff] %v762_v28  ;;  %v769_v41 = vmul.f32 %v2341_v13, %v215_v31  ;;  %v770_v42 = vmul.f32 %v2343_v14, %v216_v32  ;;  %v771_v43 = vmul.f32 %v2346_v16, %v217_v33  ;;  %v233_v7 = vld [vmem:[%s2329_s4 + $0xd0] sm:$0xff]  ;;  %v234_v8 = vld [vmem:[%s2329_s4 + $0xd8] sm:$0xff] }
  0x65   : > { %1275 = vst [vmem:[%s2379_s18 + $0x10] sm:$0xff] %v763_v29  ;;  %1276 = vst [vmem:[%s2379_s18 + $0x18] sm:$0xff] %v764_v30  ;;  %v772_v44 = vmul.f32 %v2349_v18, %v218_v38  ;;  %v773_v48 = vmul.f32 %v2352_v20, %v219_v39  ;;  %v774_v49 = vmul.f32 %v2355_v22, %v220_v40  ;;  %v235_v9 = vld [vmem:[%s2329_s4 + $0xe0] sm:$0xff]  ;;  %v236_v15 = vld [vmem:[%s2329_s4 + $0xe8] sm:$0xff]  ;;  %p2068_p3 = por %p2067_p9, %p2066_p0 }
  0x66   : > { %1277 = vst [vmem:[%s2379_s18 + $0x20] sm:$0xff] %v765_v34  ;;  %1278 = vst [vmem:[%s2379_s18 + $0x28] sm:$0xff] %v766_v35  ;;  %v775_v50 = vmul.f32 %v2358_v24, %v221_v45  ;;  %v776_v51 = vmul.f32 %v2361_v26, %v222_v46  ;;  %v777_v55 = vmul.f32 %v2341_v13, %v223_v47  ;;  %v237_v17 = vld [vmem:[%s2329_s4 + $0xf0] sm:$0xff]  ;;  %v238_v19 = vld [vmem:[%s2329_s4 + $0xf8] sm:$0xff] }
  0x67   : > { %1279 = vst [vmem:[%s2379_s18 + $0x30] sm:$0xff] %v767_v36  ;;  %1280 = vst [vmem:[%s2379_s18 + $0x38] sm:$0xff] %v768_v37  ;;  %v778_v56 = vmul.f32 %v2343_v14, %v224_v52  ;;  %v779_v57 = vmul.f32 %v2346_v16, %v225_v53  ;;  %v780_v58 = vmul.f32 %v2349_v18, %v226_v54  ;;  %v239_v27 = vld [vmem:[%s2329_s4 + $0x100] sm:$0xff]  ;;  %v240_v28 = vld [vmem:[%s2329_s4 + $0x108] sm:$0xff]  ;;  %p2069_p7 = pnand %p2068_p3, %p2062_p1 }
  0x68   : > { %1281 = vst [vmem:[%s2379_s18 + $0x40] sm:$0xff] %v769_v41  ;;  %1282 = vst [vmem:[%s2379_s18 + $0x48] sm:$0xff] %v770_v42  ;;  %v781_v62 = vmul.f32 %v2352_v20, %v227_v59  ;;  %v782_v63 = vmul.f32 %v2355_v22, %v228_v60  ;;  %v783_v0 = vmul.f32 %v2358_v24, %v229_v61  ;;  %v241_v29 = vld [vmem:[%s2329_s4 + $0x110] sm:$0xff]  ;;  %v242_v33 = vld [vmem:[%s2329_s4 + $0x118] sm:$0xff] }
  0x69   : > { %1283 = vst [vmem:[%s2379_s18 + $0x50] sm:$0xff] %v771_v43  ;;  %1284 = vst [vmem:[%s2379_s18 + $0x58] sm:$0xff] %v772_v44  ;;  %v784_v4 = vmul.f32 %v2361_v26, %v230_v1  ;;  %v785_v5 = vmul.f32 %v2341_v13, %v231_v2  ;;  %v786_v6 = vmul.f32 %v2343_v14, %v232_v3  ;;  %v243_v34 = vld [vmem:[%s2329_s4 + $0x120] sm:$0xff]  ;;  %v244_v35 = vld [vmem:[%s2329_s4 + $0x128] sm:$0xff] }
  0x6a   : > { %1285 = vst [vmem:[%s2379_s18 + $0x60] sm:$0xff] %v773_v48  ;;  %1286 = vst [vmem:[%s2379_s18 + $0x68] sm:$0xff] %v774_v49  ;;  %v787_v10 = vmul.f32 %v2346_v16, %v233_v7  ;;  %v788_v11 = vmul.f32 %v2349_v18, %v234_v8  ;;  %v789_v12 = vmul.f32 %v2352_v20, %v235_v9  ;;  %v245_v39 = vld [vmem:[%s2329_s4 + $0x130] sm:$0xff]  ;;  %v246_v40 = vld [vmem:[%s2329_s4 + $0x138] sm:$0xff] }
  0x6b   : > { %1287 = vst [vmem:[%s2379_s18 + $0x70] sm:$0xff] %v775_v50  ;;  %1288 = vst [vmem:[%s2379_s18 + $0x78] sm:$0xff] %v776_v51  ;;  %v790_v21 = vmul.f32 %v2355_v22, %v236_v15  ;;  %v791_v23 = vmul.f32 %v2358_v24, %v237_v17  ;;  %v792_v25 = vmul.f32 %v2361_v26, %v238_v19  ;;  %v247_v41 = vld [vmem:[%s2329_s4 + $0x140] sm:$0xff]  ;;  %v248_v45 = vld [vmem:[%s2329_s4 + $0x148] sm:$0xff] }
  0x6c   : > { %1289 = vst [vmem:[%s2379_s18 + $0x80] sm:$0xff] %v777_v55  ;;  %1290 = vst [vmem:[%s2379_s18 + $0x88] sm:$0xff] %v778_v56  ;;  %v793_v30 = vmul.f32 %v2341_v13, %v239_v27  ;;  %v794_v31 = vmul.f32 %v2343_v14, %v240_v28  ;;  %v795_v32 = vmul.f32 %v2346_v16, %v241_v29  ;;  %v249_v46 = vld [vmem:[%s2329_s4 + $0x150] sm:$0xff]  ;;  %v250_v47 = vld [vmem:[%s2329_s4 + $0x158] sm:$0xff] }
  0x6d   : > { %1291 = vst [vmem:[%s2379_s18 + $0x90] sm:$0xff] %v779_v57  ;;  %1292 = vst [vmem:[%s2379_s18 + $0x98] sm:$0xff] %v780_v58  ;;  %v796_v36 = vmul.f32 %v2349_v18, %v242_v33  ;;  %v797_v37 = vmul.f32 %v2352_v20, %v243_v34  ;;  %v798_v38 = vmul.f32 %v2355_v22, %v244_v35  ;;  %v251_v51 = vld [vmem:[%s2329_s4 + $0x160] sm:$0xff]  ;;  %v252_v52 = vld [vmem:[%s2329_s4 + $0x168] sm:$0xff] }
  0x6e   : > { %1293 = vst [vmem:[%s2379_s18 + $0xa0] sm:$0xff] %v781_v62  ;;  %1294 = vst [vmem:[%s2379_s18 + $0xa8] sm:$0xff] %v782_v63  ;;  %v799_v42 = vmul.f32 %v2358_v24, %v245_v39  ;;  %v800_v43 = vmul.f32 %v2361_v26, %v246_v40  ;;  %v801_v44 = vmul.f32 %v2341_v13, %v247_v41  ;;  %v253_v53 = vld [vmem:[%s2329_s4 + $0x170] sm:$0xff]  ;;  %v254_v57 = vld [vmem:[%s2329_s4 + $0x178] sm:$0xff] }
  0x6f   : > { %1295 = vst [vmem:[%s2379_s18 + $0xb0] sm:$0xff] %v783_v0  ;;  %1296 = vst [vmem:[%s2379_s18 + $0xb8] sm:$0xff] %v784_v4  ;;  %v802_v48 = vmul.f32 %v2343_v14, %v248_v45  ;;  %v803_v49 = vmul.f32 %v2346_v16, %v249_v46  ;;  %v804_v50 = vmul.f32 %v2349_v18, %v250_v47  ;;  %v255_v58 = vld [vmem:[%s2329_s4 + $0x180] sm:$0xff]  ;;  %v256_v59 = vld [vmem:[%s2329_s4 + $0x188] sm:$0xff] }
  0x70   : > { %1297 = vst [vmem:[%s2379_s18 + $0xc0] sm:$0xff] %v785_v5  ;;  %1298 = vst [vmem:[%s2379_s18 + $0xc8] sm:$0xff] %v786_v6  ;;  %v805_v54 = vmul.f32 %v2352_v20, %v251_v51  ;;  %v806_v55 = vmul.f32 %v2355_v22, %v252_v52  ;;  %v807_v56 = vmul.f32 %v2358_v24, %v253_v53  ;;  %v257_v63 = vld [vmem:[%s2329_s4 + $0x190] sm:$0xff]  ;;  %v258_v0 = vld [vmem:[%s2329_s4 + $0x198] sm:$0xff] }
  0x71   : > { %1299 = vst [vmem:[%s2379_s18 + $0xd0] sm:$0xff] %v787_v10  ;;  %1300 = vst [vmem:[%s2379_s18 + $0xd8] sm:$0xff] %v788_v11  ;;  %v808_v60 = vmul.f32 %v2361_v26, %v254_v57  ;;  %v809_v61 = vmul.f32 %v2341_v13, %v255_v58  ;;  %v810_v62 = vmul.f32 %v2343_v14, %v256_v59  ;;  %v259_v1 = vld [vmem:[%s2329_s4 + $0x1a0] sm:$0xff]  ;;  %v260_v5 = vld [vmem:[%s2329_s4 + $0x1a8] sm:$0xff] }
  0x72   : > { %1301 = vst [vmem:[%s2379_s18 + $0xe0] sm:$0xff] %v789_v12  ;;  %1302 = vst [vmem:[%s2379_s18 + $0xe8] sm:$0xff] %v790_v21  ;;  %v811_v2 = vmul.f32 %v2346_v16, %v257_v63  ;;  %v812_v3 = vmul.f32 %v2349_v18, %v258_v0  ;;  %v813_v4 = vmul.f32 %v2352_v20, %v259_v1  ;;  %v261_v6 = vld [vmem:[%s2329_s4 + $0x1b0] sm:$0xff]  ;;  %v262_v7 = vld [vmem:[%s2329_s4 + $0x1b8] sm:$0xff] }
  0x73   : > { %1303 = vst [vmem:[%s2379_s18 + $0xf0] sm:$0xff] %v791_v23  ;;  %1304 = vst [vmem:[%s2379_s18 + $0xf8] sm:$0xff] %v792_v25  ;;  %v814_v8 = vmul.f32 %v2355_v22, %v260_v5  ;;  %v815_v9 = vmul.f32 %v2358_v24, %v261_v6  ;;  %v816_v10 = vmul.f32 %v2361_v26, %v262_v7  ;;  %v263_v11 = vld [vmem:[%s2329_s4 + $0x1c0] sm:$0xff]  ;;  %v264_v12 = vld [vmem:[%s2329_s4 + $0x1c8] sm:$0xff] }
  0x74   : > { %1305 = vst [vmem:[%s2379_s18 + $0x100] sm:$0xff] %v793_v30  ;;  %1306 = vst [vmem:[%s2379_s18 + $0x108] sm:$0xff] %v794_v31  ;;  %v265_v15 = vld [vmem:[%s2329_s4 + $0x1d0] sm:$0xff]  ;;  %v817_v17 = vmul.f32 %v2341_v13, %v263_v11  ;;  %v818_v19 = vmul.f32 %v2343_v14, %v264_v12  ;;  %v266_v23 = vld [vmem:[%s2329_s4 + $0x1d8] sm:$0xff] }
  0x75   : > { %1307 = vst [vmem:[%s2379_s18 + $0x110] sm:$0xff] %v795_v32  ;;  %1308 = vst [vmem:[%s2379_s18 + $0x118] sm:$0xff] %v796_v36  ;;  %v819_v21 = vmul.f32 %v2346_v16, %v265_v15  ;;  %v267_v25 = vld [vmem:[%s2329_s4 + $0x1e0] sm:$0xff]  ;;  %v268_v27 = vld [vmem:[%s2329_s4 + $0x1e8] sm:$0xff]  ;;  %v820_v28 = vmul.f32 %v2349_v18, %v266_v23 }
  0x76   : > { %1309 = vst [vmem:[%s2379_s18 + $0x120] sm:$0xff] %v797_v37  ;;  %1310 = vst [vmem:[%s2379_s18 + $0x128] sm:$0xff] %v798_v38  ;;  %v821_v29 = vmul.f32 %v2352_v20, %v267_v25  ;;  %v822_v30 = vmul.f32 %v2355_v22, %v268_v27  ;;  %v269_v31 = vld [vmem:[%s2329_s4 + $0x1f0] sm:$0xff]  ;;  %v270_v32 = vld [vmem:[%s2329_s4 + $0x1f8] sm:$0xff] }
  0x77   : > { %1311 = vst [vmem:[%s2379_s18 + $0x130] sm:$0xff] %v799_v42  ;;  %1312 = vst [vmem:[%s2379_s18 + $0x138] sm:$0xff] %v800_v43  ;;  %v271_v33 = vld [vmem:[%s2329_s4 + $0x200] sm:$0xff]  ;;  %v823_v34 = vmul.f32 %v2358_v24, %v269_v31  ;;  %v824_v35 = vmul.f32 %v2361_v26, %v270_v32  ;;  %v272_v37 = vld [vmem:[%s2329_s4 + $0x208] sm:$0xff] }
  0x78   : > { %1313 = vst [vmem:[%s2379_s18 + $0x140] sm:$0xff] %v801_v44  ;;  %1314 = vst [vmem:[%s2379_s18 + $0x148] sm:$0xff] %v802_v48  ;;  %v825_v36 = vmul.f32 %v2341_v13, %v271_v33  ;;  %v273_v38 = vld [vmem:[%s2329_s4 + $0x210] sm:$0xff]  ;;  %v274_v39 = vld [vmem:[%s2329_s4 + $0x218] sm:$0xff]  ;;  %v826_v40 = vmul.f32 %v2343_v14, %v272_v37 }
  0x79   : > { %1315 = vst [vmem:[%s2379_s18 + $0x150] sm:$0xff] %v803_v49  ;;  %1316 = vst [vmem:[%s2379_s18 + $0x158] sm:$0xff] %v804_v50  ;;  %v827_v41 = vmul.f32 %v2346_v16, %v273_v38  ;;  %v828_v42 = vmul.f32 %v2349_v18, %v274_v39  ;;  %v275_v43 = vld [vmem:[%s2329_s4 + $0x220] sm:$0xff]  ;;  %v276_v44 = vld [vmem:[%s2329_s4 + $0x228] sm:$0xff] }
  0x7a   : > { %1317 = vst [vmem:[%s2379_s18 + $0x160] sm:$0xff] %v805_v54  ;;  %1318 = vst [vmem:[%s2379_s18 + $0x168] sm:$0xff] %v806_v55  ;;  %v277_v45 = vld [vmem:[%s2329_s4 + $0x230] sm:$0xff]  ;;  %v829_v46 = vmul.f32 %v2352_v20, %v275_v43  ;;  %v830_v47 = vmul.f32 %v2355_v22, %v276_v44  ;;  %v278_v49 = vld [vmem:[%s2329_s4 + $0x238] sm:$0xff] }
  0x7b   : > { %1319 = vst [vmem:[%s2379_s18 + $0x170] sm:$0xff] %v807_v56  ;;  %1320 = vst [vmem:[%s2379_s18 + $0x178] sm:$0xff] %v808_v60  ;;  %v831_v48 = vmul.f32 %v2358_v24, %v277_v45  ;;  %v279_v50 = vld [vmem:[%s2329_s4 + $0x240] sm:$0xff]  ;;  %v280_v51 = vld [vmem:[%s2329_s4 + $0x248] sm:$0xff]  ;;  %v832_v52 = vmul.f32 %v2361_v26, %v278_v49 }
  0x7c   : > { %1321 = vst [vmem:[%s2379_s18 + $0x180] sm:$0xff] %v809_v61  ;;  %1322 = vst [vmem:[%s2379_s18 + $0x188] sm:$0xff] %v810_v62  ;;  %v833_v53 = vmul.f32 %v2341_v13, %v279_v50  ;;  %v834_v54 = vmul.f32 %v2343_v14, %v280_v51  ;;  %v281_v55 = vld [vmem:[%s2329_s4 + $0x250] sm:$0xff]  ;;  %v282_v56 = vld [vmem:[%s2329_s4 + $0x258] sm:$0xff] }
  0x7d   : > { %1323 = vst [vmem:[%s2379_s18 + $0x190] sm:$0xff] %v811_v2  ;;  %1324 = vst [vmem:[%s2379_s18 + $0x198] sm:$0xff] %v812_v3  ;;  %v283_v57 = vld [vmem:[%s2329_s4 + $0x260] sm:$0xff]  ;;  %v835_v58 = vmul.f32 %v2346_v16, %v281_v55  ;;  %v836_v59 = vmul.f32 %v2349_v18, %v282_v56  ;;  %v284_v61 = vld [vmem:[%s2329_s4 + $0x268] sm:$0xff] }
  0x7e   : > { %1325 = vst [vmem:[%s2379_s18 + $0x1a0] sm:$0xff] %v813_v4  ;;  %1326 = vst [vmem:[%s2379_s18 + $0x1a8] sm:$0xff] %v814_v8  ;;  %v837_v60 = vmul.f32 %v2352_v20, %v283_v57  ;;  %v285_v62 = vld [vmem:[%s2329_s4 + $0x270] sm:$0xff]  ;;  %v286_v63 = vld [vmem:[%s2329_s4 + $0x278] sm:$0xff]  ;;  %v838_v0 = vmul.f32 %v2355_v22, %v284_v61 }
  0x7f   : > { %1327 = vst [vmem:[%s2379_s18 + $0x1b0] sm:$0xff] %v815_v9  ;;  %1328 = vst [vmem:[%s2379_s18 + $0x1b8] sm:$0xff] %v816_v10  ;;  %v839_v1 = vmul.f32 %v2358_v24, %v285_v62  ;;  %v840_v2 = vmul.f32 %v2361_v26, %v286_v63  ;;  %v287_v3 = vld [vmem:[%s2329_s4 + $0x280] sm:$0xff]  ;;  %v288_v4 = vld [vmem:[%s2329_s4 + $0x288] sm:$0xff] }
  0x80   : > { %1329 = vst [vmem:[%s2379_s18 + $0x1c0] sm:$0xff] %v817_v17  ;;  %1330 = vst [vmem:[%s2379_s18 + $0x1c8] sm:$0xff] %v818_v19  ;;  %v289_v5 = vld [vmem:[%s2329_s4 + $0x290] sm:$0xff]  ;;  %v841_v6 = vmul.f32 %v2341_v13, %v287_v3  ;;  %v842_v7 = vmul.f32 %v2343_v14, %v288_v4  ;;  %v290_v9 = vld [vmem:[%s2329_s4 + $0x298] sm:$0xff] }
  0x81   : > { %1331 = vst [vmem:[%s2379_s18 + $0x1d0] sm:$0xff] %v819_v21  ;;  %1332 = vst [vmem:[%s2379_s18 + $0x1d8] sm:$0xff] %v820_v28  ;;  %v843_v8 = vmul.f32 %v2346_v16, %v289_v5  ;;  %v291_v10 = vld [vmem:[%s2329_s4 + $0x2a0] sm:$0xff]  ;;  %v292_v11 = vld [vmem:[%s2329_s4 + $0x2a8] sm:$0xff]  ;;  %v844_v12 = vmul.f32 %v2349_v18, %v290_v9 }
  0x82   : > { %1333 = vst [vmem:[%s2379_s18 + $0x1e0] sm:$0xff] %v821_v29  ;;  %1334 = vst [vmem:[%s2379_s18 + $0x1e8] sm:$0xff] %v822_v30  ;;  %v845_v15 = vmul.f32 %v2352_v20, %v291_v10  ;;  %v846_v17 = vmul.f32 %v2355_v22, %v292_v11  ;;  %v293_v19 = vld [vmem:[%s2329_s4 + $0x2b0] sm:$0xff]  ;;  %v294_v21 = vld [vmem:[%s2329_s4 + $0x2b8] sm:$0xff] }
  0x83   : > { %1335 = vst [vmem:[%s2379_s18 + $0x1f0] sm:$0xff] %v823_v34  ;;  %1336 = vst [vmem:[%s2379_s18 + $0x1f8] sm:$0xff] %v824_v35  ;;  %v295_v23 = vld [vmem:[%s2329_s4 + $0x2c0] sm:$0xff]  ;;  %v847_v25 = vmul.f32 %v2358_v24, %v293_v19  ;;  %v848_v27 = vmul.f32 %v2361_v26, %v294_v21  ;;  %v296_v29 = vld [vmem:[%s2329_s4 + $0x2c8] sm:$0xff] }
  0x84   : > { %1337 = vst [vmem:[%s2379_s18 + $0x200] sm:$0xff] %v825_v36  ;;  %1338 = vst [vmem:[%s2379_s18 + $0x208] sm:$0xff] %v826_v40  ;;  %v849_v28 = vmul.f32 %v2341_v13, %v295_v23  ;;  %v297_v30 = vld [vmem:[%s2329_s4 + $0x2d0] sm:$0xff]  ;;  %v298_v31 = vld [vmem:[%s2329_s4 + $0x2d8] sm:$0xff]  ;;  %v850_v32 = vmul.f32 %v2343_v14, %v296_v29 }
  0x85   : > { %1339 = vst [vmem:[%s2379_s18 + $0x210] sm:$0xff] %v827_v41  ;;  %1340 = vst [vmem:[%s2379_s18 + $0x218] sm:$0xff] %v828_v42  ;;  %v851_v33 = vmul.f32 %v2346_v16, %v297_v30  ;;  %v852_v34 = vmul.f32 %v2349_v18, %v298_v31  ;;  %v299_v35 = vld [vmem:[%s2329_s4 + $0x2e0] sm:$0xff]  ;;  %v300_v36 = vld [vmem:[%s2329_s4 + $0x2e8] sm:$0xff] }
  0x86   : > { %1341 = vst [vmem:[%s2379_s18 + $0x220] sm:$0xff] %v829_v46  ;;  %1342 = vst [vmem:[%s2379_s18 + $0x228] sm:$0xff] %v830_v47  ;;  %v301_v37 = vld [vmem:[%s2329_s4 + $0x2f0] sm:$0xff]  ;;  %v853_v38 = vmul.f32 %v2352_v20, %v299_v35  ;;  %v854_v39 = vmul.f32 %v2355_v22, %v300_v36  ;;  %v302_v41 = vld [vmem:[%s2329_s4 + $0x2f8] sm:$0xff] }
  0x87   : > { %1343 = vst [vmem:[%s2379_s18 + $0x230] sm:$0xff] %v831_v48  ;;  %1344 = vst [vmem:[%s2379_s18 + $0x238] sm:$0xff] %v832_v52  ;;  %v855_v40 = vmul.f32 %v2358_v24, %v301_v37  ;;  %v303_v42 = vld [vmem:[%s2329_s4 + $0x300] sm:$0xff]  ;;  %v304_v43 = vld [vmem:[%s2329_s4 + $0x308] sm:$0xff]  ;;  %v856_v44 = vmul.f32 %v2361_v26, %v302_v41 }
  0x88   : > { %1345 = vst [vmem:[%s2379_s18 + $0x240] sm:$0xff] %v833_v53  ;;  %1346 = vst [vmem:[%s2379_s18 + $0x248] sm:$0xff] %v834_v54  ;;  %v857_v45 = vmul.f32 %v2341_v13, %v303_v42  ;;  %v858_v46 = vmul.f32 %v2343_v14, %v304_v43  ;;  %v305_v47 = vld [vmem:[%s2329_s4 + $0x310] sm:$0xff]  ;;  %v306_v48 = vld [vmem:[%s2329_s4 + $0x318] sm:$0xff] }
  0x89   : > { %1347 = vst [vmem:[%s2379_s18 + $0x250] sm:$0xff] %v835_v58  ;;  %1348 = vst [vmem:[%s2379_s18 + $0x258] sm:$0xff] %v836_v59  ;;  %v307_v49 = vld [vmem:[%s2329_s4 + $0x320] sm:$0xff]  ;;  %v859_v50 = vmul.f32 %v2346_v16, %v305_v47  ;;  %v860_v51 = vmul.f32 %v2349_v18, %v306_v48  ;;  %v308_v53 = vld [vmem:[%s2329_s4 + $0x328] sm:$0xff] }
  0x8a   : > { %1349 = vst [vmem:[%s2379_s18 + $0x260] sm:$0xff] %v837_v60  ;;  %1350 = vst [vmem:[%s2379_s18 + $0x268] sm:$0xff] %v838_v0  ;;  %v861_v52 = vmul.f32 %v2352_v20, %v307_v49  ;;  %v309_v54 = vld [vmem:[%s2329_s4 + $0x330] sm:$0xff]  ;;  %v310_v55 = vld [vmem:[%s2329_s4 + $0x338] sm:$0xff]  ;;  %v862_v56 = vmul.f32 %v2355_v22, %v308_v53 }
  0x8b   : > { %1351 = vst [vmem:[%s2379_s18 + $0x270] sm:$0xff] %v839_v1  ;;  %1352 = vst [vmem:[%s2379_s18 + $0x278] sm:$0xff] %v840_v2  ;;  %v863_v57 = vmul.f32 %v2358_v24, %v309_v54  ;;  %v864_v58 = vmul.f32 %v2361_v26, %v310_v55  ;;  %v311_v59 = vld [vmem:[%s2329_s4 + $0x340] sm:$0xff]  ;;  %v312_v60 = vld [vmem:[%s2329_s4 + $0x348] sm:$0xff] }
  0x8c   : > { %1353 = vst [vmem:[%s2379_s18 + $0x280] sm:$0xff] %v841_v6  ;;  %1354 = vst [vmem:[%s2379_s18 + $0x288] sm:$0xff] %v842_v7  ;;  %v313_v61 = vld [vmem:[%s2329_s4 + $0x350] sm:$0xff]  ;;  %v865_v62 = vmul.f32 %v2341_v13, %v311_v59  ;;  %v866_v63 = vmul.f32 %v2343_v14, %v312_v60  ;;  %v314_v1 = vld [vmem:[%s2329_s4 + $0x358] sm:$0xff] }
  0x8d   : > { %1355 = vst [vmem:[%s2379_s18 + $0x290] sm:$0xff] %v843_v8  ;;  %1356 = vst [vmem:[%s2379_s18 + $0x298] sm:$0xff] %v844_v12  ;;  %v867_v0 = vmul.f32 %v2346_v16, %v313_v61  ;;  %v315_v2 = vld [vmem:[%s2329_s4 + $0x360] sm:$0xff]  ;;  %v316_v3 = vld [vmem:[%s2329_s4 + $0x368] sm:$0xff]  ;;  %v868_v4 = vmul.f32 %v2349_v18, %v314_v1 }
  0x8e   : > { %1357 = vst [vmem:[%s2379_s18 + $0x2a0] sm:$0xff] %v845_v15  ;;  %1358 = vst [vmem:[%s2379_s18 + $0x2a8] sm:$0xff] %v846_v17  ;;  %v869_v5 = vmul.f32 %v2352_v20, %v315_v2  ;;  %v870_v6 = vmul.f32 %v2355_v22, %v316_v3  ;;  %v317_v7 = vld [vmem:[%s2329_s4 + $0x370] sm:$0xff]  ;;  %v318_v8 = vld [vmem:[%s2329_s4 + $0x378] sm:$0xff] }
  0x8f   : > { %1359 = vst [vmem:[%s2379_s18 + $0x2b0] sm:$0xff] %v847_v25  ;;  %1360 = vst [vmem:[%s2379_s18 + $0x2b8] sm:$0xff] %v848_v27  ;;  %v319_v9 = vld [vmem:[%s2329_s4 + $0x380] sm:$0xff]  ;;  %v871_v10 = vmul.f32 %v2358_v24, %v317_v7  ;;  %v872_v11 = vmul.f32 %v2361_v26, %v318_v8  ;;  %v320_v15 = vld [vmem:[%s2329_s4 + $0x388] sm:$0xff] }
  0x90   : > { %1361 = vst [vmem:[%s2379_s18 + $0x2c0] sm:$0xff] %v849_v28  ;;  %1362 = vst [vmem:[%s2379_s18 + $0x2c8] sm:$0xff] %v850_v32  ;;  %v873_v12 = vmul.f32 %v2341_v13, %v319_v9  ;;  %v321_v17 = vld [vmem:[%s2329_s4 + $0x390] sm:$0xff]  ;;  %v322_v19 = vld [vmem:[%s2329_s4 + $0x398] sm:$0xff]  ;;  %v874_v21 = vmul.f32 %v2343_v14, %v320_v15 }
  0x91   : > { %1363 = vst [vmem:[%s2379_s18 + $0x2d0] sm:$0xff] %v851_v33  ;;  %1364 = vst [vmem:[%s2379_s18 + $0x2d8] sm:$0xff] %v852_v34  ;;  %v875_v23 = vmul.f32 %v2346_v16, %v321_v17  ;;  %v876_v25 = vmul.f32 %v2349_v18, %v322_v19  ;;  %v323_v27 = vld [vmem:[%s2329_s4 + $0x3a0] sm:$0xff]  ;;  %v324_v28 = vld [vmem:[%s2329_s4 + $0x3a8] sm:$0xff] }
  0x92   : > { %1365 = vst [vmem:[%s2379_s18 + $0x2e0] sm:$0xff] %v853_v38  ;;  %1366 = vst [vmem:[%s2379_s18 + $0x2e8] sm:$0xff] %v854_v39  ;;  %v325_v29 = vld [vmem:[%s2329_s4 + $0x3b0] sm:$0xff]  ;;  %v877_v30 = vmul.f32 %v2352_v20, %v323_v27  ;;  %v878_v31 = vmul.f32 %v2355_v22, %v324_v28  ;;  %v326_v33 = vld [vmem:[%s2329_s4 + $0x3b8] sm:$0xff] }
  0x93   : > { %1367 = vst [vmem:[%s2379_s18 + $0x2f0] sm:$0xff] %v855_v40  ;;  %1368 = vst [vmem:[%s2379_s18 + $0x2f8] sm:$0xff] %v856_v44  ;;  %v879_v32 = vmul.f32 %v2358_v24, %v325_v29  ;;  %v327_v34 = vld [vmem:[%s2329_s4 + $0x3c0] sm:$0xff]  ;;  %v328_v35 = vld [vmem:[%s2329_s4 + $0x3c8] sm:$0xff]  ;;  %v880_v36 = vmul.f32 %v2361_v26, %v326_v33 }
  0x94   : > { %1369 = vst [vmem:[%s2379_s18 + $0x300] sm:$0xff] %v857_v45  ;;  %1370 = vst [vmem:[%s2379_s18 + $0x308] sm:$0xff] %v858_v46  ;;  %v881_v37 = vmul.f32 %v2341_v13, %v327_v34  ;;  %v882_v38 = vmul.f32 %v2343_v14, %v328_v35  ;;  %v329_v39 = vld [vmem:[%s2329_s4 + $0x3d0] sm:$0xff]  ;;  %v330_v40 = vld [vmem:[%s2329_s4 + $0x3d8] sm:$0xff] }
  0x95   : > { %1371 = vst [vmem:[%s2379_s18 + $0x310] sm:$0xff] %v859_v50  ;;  %1372 = vst [vmem:[%s2379_s18 + $0x318] sm:$0xff] %v860_v51  ;;  %v331_v41 = vld [vmem:[%s2329_s4 + $0x3e0] sm:$0xff]  ;;  %v883_v42 = vmul.f32 %v2346_v16, %v329_v39  ;;  %v884_v43 = vmul.f32 %v2349_v18, %v330_v40  ;;  %v332_v45 = vld [vmem:[%s2329_s4 + $0x3e8] sm:$0xff] }
  0x96   : > { %1373 = vst [vmem:[%s2379_s18 + $0x320] sm:$0xff] %v861_v52  ;;  %1374 = vst [vmem:[%s2379_s18 + $0x328] sm:$0xff] %v862_v56  ;;  %v885_v44 = vmul.f32 %v2352_v20, %v331_v41  ;;  %v333_v46 = vld [vmem:[%s2329_s4 + $0x3f0] sm:$0xff]  ;;  %v334_v47 = vld [vmem:[%s2329_s4 + $0x3f8] sm:$0xff]  ;;  %v886_v48 = vmul.f32 %v2355_v22, %v332_v45 }
  0x97   : > { %1375 = vst [vmem:[%s2379_s18 + $0x330] sm:$0xff] %v863_v57  ;;  %1376 = vst [vmem:[%s2379_s18 + $0x338] sm:$0xff] %v864_v58  ;;  %v887_v49 = vmul.f32 %v2358_v24, %v333_v46  ;;  %v888_v50 = vmul.f32 %v2361_v26, %v334_v47  ;;  %v335_v51 = vld [vmem:[%s2329_s4 + $0x400] sm:$0xff]  ;;  %v336_v52 = vld [vmem:[%s2329_s4 + $0x408] sm:$0xff] }
  0x98   : > { %1377 = vst [vmem:[%s2379_s18 + $0x340] sm:$0xff] %v865_v62  ;;  %1378 = vst [vmem:[%s2379_s18 + $0x348] sm:$0xff] %v866_v63  ;;  %v337_v53 = vld [vmem:[%s2329_s4 + $0x410] sm:$0xff]  ;;  %v889_v54 = vmul.f32 %v2341_v13, %v335_v51  ;;  %v890_v55 = vmul.f32 %v2343_v14, %v336_v52  ;;  %v338_v57 = vld [vmem:[%s2329_s4 + $0x418] sm:$0xff] }
  0x99   : > { %1379 = vst [vmem:[%s2379_s18 + $0x350] sm:$0xff] %v867_v0  ;;  %1380 = vst [vmem:[%s2379_s18 + $0x358] sm:$0xff] %v868_v4  ;;  %v891_v56 = vmul.f32 %v2346_v16, %v337_v53  ;;  %v339_v58 = vld [vmem:[%s2329_s4 + $0x420] sm:$0xff]  ;;  %v340_v59 = vld [vmem:[%s2329_s4 + $0x428] sm:$0xff]  ;;  %v892_v60 = vmul.f32 %v2349_v18, %v338_v57 }
  0x9a   : > { %1381 = vst [vmem:[%s2379_s18 + $0x360] sm:$0xff] %v869_v5  ;;  %1382 = vst [vmem:[%s2379_s18 + $0x368] sm:$0xff] %v870_v6  ;;  %v893_v61 = vmul.f32 %v2352_v20, %v339_v58  ;;  %v894_v62 = vmul.f32 %v2355_v22, %v340_v59  ;;  %v341_v63 = vld [vmem:[%s2329_s4 + $0x430] sm:$0xff]  ;;  %v342_v0 = vld [vmem:[%s2329_s4 + $0x438] sm:$0xff] }
  0x9b   : > { %1383 = vst [vmem:[%s2379_s18 + $0x370] sm:$0xff] %v871_v10  ;;  %1384 = vst [vmem:[%s2379_s18 + $0x378] sm:$0xff] %v872_v11  ;;  %v343_v1 = vld [vmem:[%s2329_s4 + $0x440] sm:$0xff]  ;;  %v895_v2 = vmul.f32 %v2358_v24, %v341_v63  ;;  %v896_v3 = vmul.f32 %v2361_v26, %v342_v0  ;;  %v344_v5 = vld [vmem:[%s2329_s4 + $0x448] sm:$0xff] }
  0x9c   : > { %1385 = vst [vmem:[%s2379_s18 + $0x380] sm:$0xff] %v873_v12  ;;  %1386 = vst [vmem:[%s2379_s18 + $0x388] sm:$0xff] %v874_v21  ;;  %v897_v4 = vmul.f32 %v2341_v13, %v343_v1  ;;  %v345_v6 = vld [vmem:[%s2329_s4 + $0x450] sm:$0xff]  ;;  %v346_v7 = vld [vmem:[%s2329_s4 + $0x458] sm:$0xff]  ;;  %v898_v8 = vmul.f32 %v2343_v14, %v344_v5 }
  0x9d   : > { %1387 = vst [vmem:[%s2379_s18 + $0x390] sm:$0xff] %v875_v23  ;;  %1388 = vst [vmem:[%s2379_s18 + $0x398] sm:$0xff] %v876_v25  ;;  %v899_v9 = vmul.f32 %v2346_v16, %v345_v6  ;;  %v900_v10 = vmul.f32 %v2349_v18, %v346_v7  ;;  %v347_v11 = vld [vmem:[%s2329_s4 + $0x460] sm:$0xff]  ;;  %v348_v12 = vld [vmem:[%s2329_s4 + $0x468] sm:$0xff] }
  0x9e   : > { %1389 = vst [vmem:[%s2379_s18 + $0x3a0] sm:$0xff] %v877_v30  ;;  %1390 = vst [vmem:[%s2379_s18 + $0x3a8] sm:$0xff] %v878_v31  ;;  %v349_v15 = vld [vmem:[%s2329_s4 + $0x470] sm:$0xff]  ;;  %v901_v17 = vmul.f32 %v2352_v20, %v347_v11  ;;  %v902_v19 = vmul.f32 %v2355_v22, %v348_v12  ;;  %v350_v23 = vld [vmem:[%s2329_s4 + $0x478] sm:$0xff] }
  0x9f   : > { %1391 = vst [vmem:[%s2379_s18 + $0x3b0] sm:$0xff] %v879_v32  ;;  %1392 = vst [vmem:[%s2379_s18 + $0x3b8] sm:$0xff] %v880_v36  ;;  %v903_v21 = vmul.f32 %v2358_v24, %v349_v15  ;;  %v351_v25 = vld [vmem:[%s2329_s4 + $0x480] sm:$0xff]  ;;  %v352_v27 = vld [vmem:[%s2329_s4 + $0x488] sm:$0xff]  ;;  %v904_v28 = vmul.f32 %v2361_v26, %v350_v23 }
  0xa0   : > { %1393 = vst [vmem:[%s2379_s18 + $0x3c0] sm:$0xff] %v881_v37  ;;  %1394 = vst [vmem:[%s2379_s18 + $0x3c8] sm:$0xff] %v882_v38  ;;  %v905_v29 = vmul.f32 %v2341_v13, %v351_v25  ;;  %v906_v30 = vmul.f32 %v2343_v14, %v352_v27  ;;  %v353_v31 = vld [vmem:[%s2329_s4 + $0x490] sm:$0xff]  ;;  %v354_v32 = vld [vmem:[%s2329_s4 + $0x498] sm:$0xff] }
  0xa1   : > { %1395 = vst [vmem:[%s2379_s18 + $0x3d0] sm:$0xff] %v883_v42  ;;  %1396 = vst [vmem:[%s2379_s18 + $0x3d8] sm:$0xff] %v884_v43  ;;  %v355_v33 = vld [vmem:[%s2329_s4 + $0x4a0] sm:$0xff]  ;;  %v907_v34 = vmul.f32 %v2346_v16, %v353_v31  ;;  %v908_v35 = vmul.f32 %v2349_v18, %v354_v32  ;;  %v356_v37 = vld [vmem:[%s2329_s4 + $0x4a8] sm:$0xff] }
  0xa2   : > { %1397 = vst [vmem:[%s2379_s18 + $0x3e0] sm:$0xff] %v885_v44  ;;  %1398 = vst [vmem:[%s2379_s18 + $0x3e8] sm:$0xff] %v886_v48  ;;  %v909_v36 = vmul.f32 %v2352_v20, %v355_v33  ;;  %v357_v38 = vld [vmem:[%s2329_s4 + $0x4b0] sm:$0xff]  ;;  %v358_v39 = vld [vmem:[%s2329_s4 + $0x4b8] sm:$0xff]  ;;  %v910_v40 = vmul.f32 %v2355_v22, %v356_v37 }
  0xa3   : > { %1399 = vst [vmem:[%s2379_s18 + $0x3f0] sm:$0xff] %v887_v49  ;;  %1400 = vst [vmem:[%s2379_s18 + $0x3f8] sm:$0xff] %v888_v50  ;;  %v911_v41 = vmul.f32 %v2358_v24, %v357_v38  ;;  %v912_v42 = vmul.f32 %v2361_v26, %v358_v39  ;;  %v359_v43 = vld [vmem:[%s2329_s4 + $0x4c0] sm:$0xff]  ;;  %v360_v44 = vld [vmem:[%s2329_s4 + $0x4c8] sm:$0xff] }
  0xa4   : > { %1401 = vst [vmem:[%s2379_s18 + $0x400] sm:$0xff] %v889_v54  ;;  %1402 = vst [vmem:[%s2379_s18 + $0x408] sm:$0xff] %v890_v55  ;;  %v361_v45 = vld [vmem:[%s2329_s4 + $0x4d0] sm:$0xff]  ;;  %v913_v46 = vmul.f32 %v2341_v13, %v359_v43  ;;  %v914_v47 = vmul.f32 %v2343_v14, %v360_v44  ;;  %v362_v49 = vld [vmem:[%s2329_s4 + $0x4d8] sm:$0xff] }
  0xa5   : > { %1403 = vst [vmem:[%s2379_s18 + $0x410] sm:$0xff] %v891_v56  ;;  %1404 = vst [vmem:[%s2379_s18 + $0x418] sm:$0xff] %v892_v60  ;;  %v915_v48 = vmul.f32 %v2346_v16, %v361_v45  ;;  %v363_v50 = vld [vmem:[%s2329_s4 + $0x4e0] sm:$0xff]  ;;  %v364_v51 = vld [vmem:[%s2329_s4 + $0x4e8] sm:$0xff]  ;;  %v916_v52 = vmul.f32 %v2349_v18, %v362_v49 }
  0xa6   : > { %1405 = vst [vmem:[%s2379_s18 + $0x420] sm:$0xff] %v893_v61  ;;  %1406 = vst [vmem:[%s2379_s18 + $0x428] sm:$0xff] %v894_v62  ;;  %v917_v53 = vmul.f32 %v2352_v20, %v363_v50  ;;  %v918_v54 = vmul.f32 %v2355_v22, %v364_v51  ;;  %v365_v55 = vld [vmem:[%s2329_s4 + $0x4f0] sm:$0xff]  ;;  %v366_v56 = vld [vmem:[%s2329_s4 + $0x4f8] sm:$0xff] }
  0xa7   : > { %1407 = vst [vmem:[%s2379_s18 + $0x430] sm:$0xff] %v895_v2  ;;  %1408 = vst [vmem:[%s2379_s18 + $0x438] sm:$0xff] %v896_v3  ;;  %v367_v57 = vld [vmem:[%s2329_s4 + $0x500] sm:$0xff]  ;;  %v919_v58 = vmul.f32 %v2358_v24, %v365_v55  ;;  %v920_v59 = vmul.f32 %v2361_v26, %v366_v56  ;;  %v368_v61 = vld [vmem:[%s2329_s4 + $0x508] sm:$0xff] }
  0xa8   : > { %1409 = vst [vmem:[%s2379_s18 + $0x440] sm:$0xff] %v897_v4  ;;  %1410 = vst [vmem:[%s2379_s18 + $0x448] sm:$0xff] %v898_v8  ;;  %v921_v60 = vmul.f32 %v2341_v13, %v367_v57  ;;  %v369_v62 = vld [vmem:[%s2329_s4 + $0x510] sm:$0xff]  ;;  %v370_v63 = vld [vmem:[%s2329_s4 + $0x518] sm:$0xff]  ;;  %v922_v0 = vmul.f32 %v2343_v14, %v368_v61 }
  0xa9   : > { %1411 = vst [vmem:[%s2379_s18 + $0x450] sm:$0xff] %v899_v9  ;;  %1412 = vst [vmem:[%s2379_s18 + $0x458] sm:$0xff] %v900_v10  ;;  %v923_v1 = vmul.f32 %v2346_v16, %v369_v62  ;;  %v924_v2 = vmul.f32 %v2349_v18, %v370_v63  ;;  %v371_v3 = vld [vmem:[%s2329_s4 + $0x520] sm:$0xff]  ;;  %v372_v4 = vld [vmem:[%s2329_s4 + $0x528] sm:$0xff] }
  0xaa   : > { %1413 = vst [vmem:[%s2379_s18 + $0x460] sm:$0xff] %v901_v17  ;;  %1414 = vst [vmem:[%s2379_s18 + $0x468] sm:$0xff] %v902_v19  ;;  %v373_v5 = vld [vmem:[%s2329_s4 + $0x530] sm:$0xff]  ;;  %v925_v6 = vmul.f32 %v2352_v20, %v371_v3  ;;  %v926_v7 = vmul.f32 %v2355_v22, %v372_v4  ;;  %v374_v9 = vld [vmem:[%s2329_s4 + $0x538] sm:$0xff] }
  0xab   : > { %1415 = vst [vmem:[%s2379_s18 + $0x470] sm:$0xff] %v903_v21  ;;  %1416 = vst [vmem:[%s2379_s18 + $0x478] sm:$0xff] %v904_v28  ;;  %v927_v8 = vmul.f32 %v2358_v24, %v373_v5  ;;  %v375_v10 = vld [vmem:[%s2329_s4 + $0x540] sm:$0xff]  ;;  %v376_v11 = vld [vmem:[%s2329_s4 + $0x548] sm:$0xff]  ;;  %v928_v12 = vmul.f32 %v2361_v26, %v374_v9 }
  0xac   : > { %1417 = vst [vmem:[%s2379_s18 + $0x480] sm:$0xff] %v905_v29  ;;  %1418 = vst [vmem:[%s2379_s18 + $0x488] sm:$0xff] %v906_v30  ;;  %v929_v15 = vmul.f32 %v2341_v13, %v375_v10  ;;  %v930_v17 = vmul.f32 %v2343_v14, %v376_v11  ;;  %v377_v19 = vld [vmem:[%s2329_s4 + $0x550] sm:$0xff]  ;;  %v378_v21 = vld [vmem:[%s2329_s4 + $0x558] sm:$0xff] }
  0xad   : > { %1419 = vst [vmem:[%s2379_s18 + $0x490] sm:$0xff] %v907_v34  ;;  %1420 = vst [vmem:[%s2379_s18 + $0x498] sm:$0xff] %v908_v35  ;;  %v379_v23 = vld [vmem:[%s2329_s4 + $0x560] sm:$0xff]  ;;  %v931_v25 = vmul.f32 %v2346_v16, %v377_v19  ;;  %v932_v27 = vmul.f32 %v2349_v18, %v378_v21  ;;  %v380_v29 = vld [vmem:[%s2329_s4 + $0x568] sm:$0xff] }
  0xae   : > { %1421 = vst [vmem:[%s2379_s18 + $0x4a0] sm:$0xff] %v909_v36  ;;  %1422 = vst [vmem:[%s2379_s18 + $0x4a8] sm:$0xff] %v910_v40  ;;  %v933_v28 = vmul.f32 %v2352_v20, %v379_v23  ;;  %v381_v30 = vld [vmem:[%s2329_s4 + $0x570] sm:$0xff]  ;;  %v382_v31 = vld [vmem:[%s2329_s4 + $0x578] sm:$0xff]  ;;  %v934_v32 = vmul.f32 %v2355_v22, %v380_v29 }
  0xaf   : > { %1423 = vst [vmem:[%s2379_s18 + $0x4b0] sm:$0xff] %v911_v41  ;;  %1424 = vst [vmem:[%s2379_s18 + $0x4b8] sm:$0xff] %v912_v42  ;;  %v935_v33 = vmul.f32 %v2358_v24, %v381_v30  ;;  %v936_v34 = vmul.f32 %v2361_v26, %v382_v31  ;;  %v383_v35 = vld [vmem:[%s2329_s4 + $0x580] sm:$0xff]  ;;  %v384_v36 = vld [vmem:[%s2329_s4 + $0x588] sm:$0xff] }
  0xb0   : > { %1425 = vst [vmem:[%s2379_s18 + $0x4c0] sm:$0xff] %v913_v46  ;;  %1426 = vst [vmem:[%s2379_s18 + $0x4c8] sm:$0xff] %v914_v47  ;;  %v385_v37 = vld [vmem:[%s2329_s4 + $0x590] sm:$0xff]  ;;  %v937_v38 = vmul.f32 %v2341_v13, %v383_v35  ;;  %v938_v39 = vmul.f32 %v2343_v14, %v384_v36  ;;  %v386_v41 = vld [vmem:[%s2329_s4 + $0x598] sm:$0xff] }
  0xb1   : > { %1427 = vst [vmem:[%s2379_s18 + $0x4d0] sm:$0xff] %v915_v48  ;;  %1428 = vst [vmem:[%s2379_s18 + $0x4d8] sm:$0xff] %v916_v52  ;;  %v939_v40 = vmul.f32 %v2346_v16, %v385_v37  ;;  %v387_v42 = vld [vmem:[%s2329_s4 + $0x5a0] sm:$0xff]  ;;  %v388_v43 = vld [vmem:[%s2329_s4 + $0x5a8] sm:$0xff]  ;;  %v940_v44 = vmul.f32 %v2349_v18, %v386_v41 }
  0xb2   : > { %1429 = vst [vmem:[%s2379_s18 + $0x4e0] sm:$0xff] %v917_v53  ;;  %1430 = vst [vmem:[%s2379_s18 + $0x4e8] sm:$0xff] %v918_v54  ;;  %v941_v45 = vmul.f32 %v2352_v20, %v387_v42  ;;  %v942_v46 = vmul.f32 %v2355_v22, %v388_v43  ;;  %v389_v47 = vld [vmem:[%s2329_s4 + $0x5b0] sm:$0xff]  ;;  %v390_v48 = vld [vmem:[%s2329_s4 + $0x5b8] sm:$0xff] }
  0xb3   : > { %1431 = vst [vmem:[%s2379_s18 + $0x4f0] sm:$0xff] %v919_v58  ;;  %1432 = vst [vmem:[%s2379_s18 + $0x4f8] sm:$0xff] %v920_v59  ;;  %v391_v49 = vld [vmem:[%s2329_s4 + $0x5c0] sm:$0xff]  ;;  %v943_v50 = vmul.f32 %v2358_v24, %v389_v47  ;;  %v944_v51 = vmul.f32 %v2361_v26, %v390_v48  ;;  %v392_v53 = vld [vmem:[%s2329_s4 + $0x5c8] sm:$0xff] }
  0xb4   : > { %1433 = vst [vmem:[%s2379_s18 + $0x500] sm:$0xff] %v921_v60  ;;  %1434 = vst [vmem:[%s2379_s18 + $0x508] sm:$0xff] %v922_v0  ;;  %v945_v52 = vmul.f32 %v2341_v13, %v391_v49  ;;  %v393_v54 = vld [vmem:[%s2329_s4 + $0x5d0] sm:$0xff]  ;;  %v394_v55 = vld [vmem:[%s2329_s4 + $0x5d8] sm:$0xff]  ;;  %v946_v56 = vmul.f32 %v2343_v14, %v392_v53 }
  0xb5   : > { %1435 = vst [vmem:[%s2379_s18 + $0x510] sm:$0xff] %v923_v1  ;;  %1436 = vst [vmem:[%s2379_s18 + $0x518] sm:$0xff] %v924_v2  ;;  %v947_v57 = vmul.f32 %v2346_v16, %v393_v54  ;;  %v948_v58 = vmul.f32 %v2349_v18, %v394_v55  ;;  %v395_v59 = vld [vmem:[%s2329_s4 + $0x5e0] sm:$0xff]  ;;  %v396_v60 = vld [vmem:[%s2329_s4 + $0x5e8] sm:$0xff] }
  0xb6   : > { %1437 = vst [vmem:[%s2379_s18 + $0x520] sm:$0xff] %v925_v6  ;;  %1438 = vst [vmem:[%s2379_s18 + $0x528] sm:$0xff] %v926_v7  ;;  %v397_v61 = vld [vmem:[%s2329_s4 + $0x5f0] sm:$0xff]  ;;  %v949_v62 = vmul.f32 %v2352_v20, %v395_v59  ;;  %v950_v63 = vmul.f32 %v2355_v22, %v396_v60  ;;  %v398_v1 = vld [vmem:[%s2329_s4 + $0x5f8] sm:$0xff] }
  0xb7   : > { %1439 = vst [vmem:[%s2379_s18 + $0x530] sm:$0xff] %v927_v8  ;;  %1440 = vst [vmem:[%s2379_s18 + $0x538] sm:$0xff] %v928_v12  ;;  %v951_v0 = vmul.f32 %v2358_v24, %v397_v61  ;;  %v399_v2 = vld [vmem:[%s2329_s4 + $0x600] sm:$0xff]  ;;  %v400_v3 = vld [vmem:[%s2329_s4 + $0x608] sm:$0xff]  ;;  %v952_v4 = vmul.f32 %v2361_v26, %v398_v1 }
  0xb8   : > { %1441 = vst [vmem:[%s2379_s18 + $0x540] sm:$0xff] %v929_v15  ;;  %1442 = vst [vmem:[%s2379_s18 + $0x548] sm:$0xff] %v930_v17  ;;  %v953_v5 = vmul.f32 %v2341_v13, %v399_v2  ;;  %v954_v6 = vmul.f32 %v2343_v14, %v400_v3  ;;  %v401_v7 = vld [vmem:[%s2329_s4 + $0x610] sm:$0xff]  ;;  %v402_v8 = vld [vmem:[%s2329_s4 + $0x618] sm:$0xff] }
  0xb9   : > { %1443 = vst [vmem:[%s2379_s18 + $0x550] sm:$0xff] %v931_v25  ;;  %1444 = vst [vmem:[%s2379_s18 + $0x558] sm:$0xff] %v932_v27  ;;  %v403_v9 = vld [vmem:[%s2329_s4 + $0x620] sm:$0xff]  ;;  %v955_v10 = vmul.f32 %v2346_v16, %v401_v7  ;;  %v956_v11 = vmul.f32 %v2349_v18, %v402_v8  ;;  %v404_v15 = vld [vmem:[%s2329_s4 + $0x628] sm:$0xff] }
  0xba   : > { %1445 = vst [vmem:[%s2379_s18 + $0x560] sm:$0xff] %v933_v28  ;;  %1446 = vst [vmem:[%s2379_s18 + $0x568] sm:$0xff] %v934_v32  ;;  %v957_v12 = vmul.f32 %v2352_v20, %v403_v9  ;;  %v405_v17 = vld [vmem:[%s2329_s4 + $0x630] sm:$0xff]  ;;  %v406_v19 = vld [vmem:[%s2329_s4 + $0x638] sm:$0xff]  ;;  %v958_v21 = vmul.f32 %v2355_v22, %v404_v15 }
  0xbb   : > { %1447 = vst [vmem:[%s2379_s18 + $0x570] sm:$0xff] %v935_v33  ;;  %1448 = vst [vmem:[%s2379_s18 + $0x578] sm:$0xff] %v936_v34  ;;  %v959_v23 = vmul.f32 %v2358_v24, %v405_v17  ;;  %v960_v25 = vmul.f32 %v2361_v26, %v406_v19  ;;  %v407_v27 = vld [vmem:[%s2329_s4 + $0x640] sm:$0xff]  ;;  %v408_v28 = vld [vmem:[%s2329_s4 + $0x648] sm:$0xff] }
  0xbc   : > { %1449 = vst [vmem:[%s2379_s18 + $0x580] sm:$0xff] %v937_v38  ;;  %1450 = vst [vmem:[%s2379_s18 + $0x588] sm:$0xff] %v938_v39  ;;  %v409_v29 = vld [vmem:[%s2329_s4 + $0x650] sm:$0xff]  ;;  %v961_v30 = vmul.f32 %v2341_v13, %v407_v27  ;;  %v962_v31 = vmul.f32 %v2343_v14, %v408_v28  ;;  %v410_v33 = vld [vmem:[%s2329_s4 + $0x658] sm:$0xff] }
  0xbd   : > { %1451 = vst [vmem:[%s2379_s18 + $0x590] sm:$0xff] %v939_v40  ;;  %1452 = vst [vmem:[%s2379_s18 + $0x598] sm:$0xff] %v940_v44  ;;  %v963_v32 = vmul.f32 %v2346_v16, %v409_v29  ;;  %v411_v34 = vld [vmem:[%s2329_s4 + $0x660] sm:$0xff]  ;;  %v412_v35 = vld [vmem:[%s2329_s4 + $0x668] sm:$0xff]  ;;  %v964_v36 = vmul.f32 %v2349_v18, %v410_v33 }
  0xbe   : > { %1453 = vst [vmem:[%s2379_s18 + $0x5a0] sm:$0xff] %v941_v45  ;;  %1454 = vst [vmem:[%s2379_s18 + $0x5a8] sm:$0xff] %v942_v46  ;;  %v965_v37 = vmul.f32 %v2352_v20, %v411_v34  ;;  %v966_v38 = vmul.f32 %v2355_v22, %v412_v35  ;;  %v413_v39 = vld [vmem:[%s2329_s4 + $0x670] sm:$0xff]  ;;  %v414_v40 = vld [vmem:[%s2329_s4 + $0x678] sm:$0xff] }
  0xbf   : > { %1455 = vst [vmem:[%s2379_s18 + $0x5b0] sm:$0xff] %v943_v50  ;;  %1456 = vst [vmem:[%s2379_s18 + $0x5b8] sm:$0xff] %v944_v51  ;;  %v415_v41 = vld [vmem:[%s2329_s4 + $0x680] sm:$0xff]  ;;  %v967_v42 = vmul.f32 %v2358_v24, %v413_v39  ;;  %v968_v43 = vmul.f32 %v2361_v26, %v414_v40  ;;  %v416_v45 = vld [vmem:[%s2329_s4 + $0x688] sm:$0xff] }
  0xc0   : > { %1457 = vst [vmem:[%s2379_s18 + $0x5c0] sm:$0xff] %v945_v52  ;;  %1458 = vst [vmem:[%s2379_s18 + $0x5c8] sm:$0xff] %v946_v56  ;;  %v969_v44 = vmul.f32 %v2341_v13, %v415_v41  ;;  %v417_v46 = vld [vmem:[%s2329_s4 + $0x690] sm:$0xff]  ;;  %v418_v47 = vld [vmem:[%s2329_s4 + $0x698] sm:$0xff]  ;;  %v970_v48 = vmul.f32 %v2343_v14, %v416_v45 }
  0xc1   : > { %1459 = vst [vmem:[%s2379_s18 + $0x5d0] sm:$0xff] %v947_v57  ;;  %1460 = vst [vmem:[%s2379_s18 + $0x5d8] sm:$0xff] %v948_v58  ;;  %v971_v49 = vmul.f32 %v2346_v16, %v417_v46  ;;  %v972_v50 = vmul.f32 %v2349_v18, %v418_v47  ;;  %v419_v51 = vld [vmem:[%s2329_s4 + $0x6a0] sm:$0xff]  ;;  %v420_v52 = vld [vmem:[%s2329_s4 + $0x6a8] sm:$0xff] }
  0xc2   : > { %1461 = vst [vmem:[%s2379_s18 + $0x5e0] sm:$0xff] %v949_v62  ;;  %1462 = vst [vmem:[%s2379_s18 + $0x5e8] sm:$0xff] %v950_v63  ;;  %v421_v53 = vld [vmem:[%s2329_s4 + $0x6b0] sm:$0xff]  ;;  %v973_v54 = vmul.f32 %v2352_v20, %v419_v51  ;;  %v974_v55 = vmul.f32 %v2355_v22, %v420_v52  ;;  %v422_v57 = vld [vmem:[%s2329_s4 + $0x6b8] sm:$0xff] }
  0xc3   : > { %1463 = vst [vmem:[%s2379_s18 + $0x5f0] sm:$0xff] %v951_v0  ;;  %1464 = vst [vmem:[%s2379_s18 + $0x5f8] sm:$0xff] %v952_v4  ;;  %v975_v56 = vmul.f32 %v2358_v24, %v421_v53  ;;  %v423_v58 = vld [vmem:[%s2329_s4 + $0x6c0] sm:$0xff]  ;;  %v424_v59 = vld [vmem:[%s2329_s4 + $0x6c8] sm:$0xff]  ;;  %v976_v60 = vmul.f32 %v2361_v26, %v422_v57 }
  0xc4   : > { %1465 = vst [vmem:[%s2379_s18 + $0x600] sm:$0xff] %v953_v5  ;;  %1466 = vst [vmem:[%s2379_s18 + $0x608] sm:$0xff] %v954_v6  ;;  %v977_v61 = vmul.f32 %v2341_v13, %v423_v58  ;;  %v978_v62 = vmul.f32 %v2343_v14, %v424_v59  ;;  %v425_v63 = vld [vmem:[%s2329_s4 + $0x6d0] sm:$0xff]  ;;  %v426_v0 = vld [vmem:[%s2329_s4 + $0x6d8] sm:$0xff] }
  0xc5   : > { %1467 = vst [vmem:[%s2379_s18 + $0x610] sm:$0xff] %v955_v10  ;;  %1468 = vst [vmem:[%s2379_s18 + $0x618] sm:$0xff] %v956_v11  ;;  %v427_v1 = vld [vmem:[%s2329_s4 + $0x6e0] sm:$0xff]  ;;  %v979_v2 = vmul.f32 %v2346_v16, %v425_v63  ;;  %v980_v3 = vmul.f32 %v2349_v18, %v426_v0  ;;  %v428_v5 = vld [vmem:[%s2329_s4 + $0x6e8] sm:$0xff] }
  0xc6   : > { %1469 = vst [vmem:[%s2379_s18 + $0x620] sm:$0xff] %v957_v12  ;;  %1470 = vst [vmem:[%s2379_s18 + $0x628] sm:$0xff] %v958_v21  ;;  %v981_v4 = vmul.f32 %v2352_v20, %v427_v1  ;;  %v429_v6 = vld [vmem:[%s2329_s4 + $0x6f0] sm:$0xff]  ;;  %v430_v7 = vld [vmem:[%s2329_s4 + $0x6f8] sm:$0xff]  ;;  %v982_v8 = vmul.f32 %v2355_v22, %v428_v5 }
  0xc7   : > { %1471 = vst [vmem:[%s2379_s18 + $0x630] sm:$0xff] %v959_v23  ;;  %1472 = vst [vmem:[%s2379_s18 + $0x638] sm:$0xff] %v960_v25  ;;  %v983_v9 = vmul.f32 %v2358_v24, %v429_v6  ;;  %v984_v10 = vmul.f32 %v2361_v26, %v430_v7  ;;  %v431_v11 = vld [vmem:[%s2329_s4 + $0x700] sm:$0xff]  ;;  %v432_v12 = vld [vmem:[%s2329_s4 + $0x708] sm:$0xff] }
  0xc8   : > { %1473 = vst [vmem:[%s2379_s18 + $0x640] sm:$0xff] %v961_v30  ;;  %1474 = vst [vmem:[%s2379_s18 + $0x648] sm:$0xff] %v962_v31  ;;  %v433_v15 = vld [vmem:[%s2329_s4 + $0x710] sm:$0xff]  ;;  %v985_v17 = vmul.f32 %v2341_v13, %v431_v11  ;;  %v986_v19 = vmul.f32 %v2343_v14, %v432_v12  ;;  %v434_v23 = vld [vmem:[%s2329_s4 + $0x718] sm:$0xff] }
  0xc9   : > { %1475 = vst [vmem:[%s2379_s18 + $0x650] sm:$0xff] %v963_v32  ;;  %1476 = vst [vmem:[%s2379_s18 + $0x658] sm:$0xff] %v964_v36  ;;  %v987_v21 = vmul.f32 %v2346_v16, %v433_v15  ;;  %v435_v25 = vld [vmem:[%s2329_s4 + $0x720] sm:$0xff]  ;;  %v436_v27 = vld [vmem:[%s2329_s4 + $0x728] sm:$0xff]  ;;  %v988_v28 = vmul.f32 %v2349_v18, %v434_v23 }
  0xca   : > { %1477 = vst [vmem:[%s2379_s18 + $0x660] sm:$0xff] %v965_v37  ;;  %1478 = vst [vmem:[%s2379_s18 + $0x668] sm:$0xff] %v966_v38  ;;  %v989_v29 = vmul.f32 %v2352_v20, %v435_v25  ;;  %v990_v30 = vmul.f32 %v2355_v22, %v436_v27  ;;  %v437_v31 = vld [vmem:[%s2329_s4 + $0x730] sm:$0xff]  ;;  %v438_v32 = vld [vmem:[%s2329_s4 + $0x738] sm:$0xff] }
  0xcb   : > { %1479 = vst [vmem:[%s2379_s18 + $0x670] sm:$0xff] %v967_v42  ;;  %1480 = vst [vmem:[%s2379_s18 + $0x678] sm:$0xff] %v968_v43  ;;  %v439_v33 = vld [vmem:[%s2329_s4 + $0x740] sm:$0xff]  ;;  %v991_v34 = vmul.f32 %v2358_v24, %v437_v31  ;;  %v992_v35 = vmul.f32 %v2361_v26, %v438_v32  ;;  %v440_v37 = vld [vmem:[%s2329_s4 + $0x748] sm:$0xff] }
  0xcc   : > { %1481 = vst [vmem:[%s2379_s18 + $0x680] sm:$0xff] %v969_v44  ;;  %1482 = vst [vmem:[%s2379_s18 + $0x688] sm:$0xff] %v970_v48  ;;  %v993_v36 = vmul.f32 %v2341_v13, %v439_v33  ;;  %v441_v38 = vld [vmem:[%s2329_s4 + $0x750] sm:$0xff]  ;;  %v442_v39 = vld [vmem:[%s2329_s4 + $0x758] sm:$0xff]  ;;  %v994_v40 = vmul.f32 %v2343_v14, %v440_v37 }
  0xcd   : > { %1483 = vst [vmem:[%s2379_s18 + $0x690] sm:$0xff] %v971_v49  ;;  %1484 = vst [vmem:[%s2379_s18 + $0x698] sm:$0xff] %v972_v50  ;;  %v995_v41 = vmul.f32 %v2346_v16, %v441_v38  ;;  %v996_v42 = vmul.f32 %v2349_v18, %v442_v39  ;;  %v443_v43 = vld [vmem:[%s2329_s4 + $0x760] sm:$0xff]  ;;  %v444_v44 = vld [vmem:[%s2329_s4 + $0x768] sm:$0xff] }
  0xce   : > { %1485 = vst [vmem:[%s2379_s18 + $0x6a0] sm:$0xff] %v973_v54  ;;  %1486 = vst [vmem:[%s2379_s18 + $0x6a8] sm:$0xff] %v974_v55  ;;  %v445_v45 = vld [vmem:[%s2329_s4 + $0x770] sm:$0xff]  ;;  %v997_v46 = vmul.f32 %v2352_v20, %v443_v43  ;;  %v998_v47 = vmul.f32 %v2355_v22, %v444_v44  ;;  %v446_v49 = vld [vmem:[%s2329_s4 + $0x778] sm:$0xff] }
  0xcf   : > { %1487 = vst [vmem:[%s2379_s18 + $0x6b0] sm:$0xff] %v975_v56  ;;  %1488 = vst [vmem:[%s2379_s18 + $0x6b8] sm:$0xff] %v976_v60  ;;  %v999_v48 = vmul.f32 %v2358_v24, %v445_v45  ;;  %v447_v50 = vld [vmem:[%s2329_s4 + $0x780] sm:$0xff]  ;;  %v448_v51 = vld [vmem:[%s2329_s4 + $0x788] sm:$0xff]  ;;  %v1000_v52 = vmul.f32 %v2361_v26, %v446_v49 }
  0xd0   : > { %1489 = vst [vmem:[%s2379_s18 + $0x6c0] sm:$0xff] %v977_v61  ;;  %1490 = vst [vmem:[%s2379_s18 + $0x6c8] sm:$0xff] %v978_v62  ;;  %v1001_v53 = vmul.f32 %v2341_v13, %v447_v50  ;;  %v1002_v54 = vmul.f32 %v2343_v14, %v448_v51  ;;  %v449_v55 = vld [vmem:[%s2329_s4 + $0x790] sm:$0xff]  ;;  %v450_v56 = vld [vmem:[%s2329_s4 + $0x798] sm:$0xff] }
  0xd1   : > { %1491 = vst [vmem:[%s2379_s18 + $0x6d0] sm:$0xff] %v979_v2  ;;  %1492 = vst [vmem:[%s2379_s18 + $0x6d8] sm:$0xff] %v980_v3  ;;  %v451_v57 = vld [vmem:[%s2329_s4 + $0x7a0] sm:$0xff]  ;;  %v1003_v58 = vmul.f32 %v2346_v16, %v449_v55  ;;  %v1004_v59 = vmul.f32 %v2349_v18, %v450_v56  ;;  %v452_v61 = vld [vmem:[%s2329_s4 + $0x7a8] sm:$0xff] }
  0xd2   : > { %1493 = vst [vmem:[%s2379_s18 + $0x6e0] sm:$0xff] %v981_v4  ;;  %1494 = vst [vmem:[%s2379_s18 + $0x6e8] sm:$0xff] %v982_v8  ;;  %v1005_v60 = vmul.f32 %v2352_v20, %v451_v57  ;;  %v453_v62 = vld [vmem:[%s2329_s4 + $0x7b0] sm:$0xff]  ;;  %v454_v63 = vld [vmem:[%s2329_s4 + $0x7b8] sm:$0xff]  ;;  %v1006_v0 = vmul.f32 %v2355_v22, %v452_v61 }
  0xd3   : > { %1495 = vst [vmem:[%s2379_s18 + $0x6f0] sm:$0xff] %v983_v9  ;;  %1496 = vst [vmem:[%s2379_s18 + $0x6f8] sm:$0xff] %v984_v10  ;;  %v1007_v1 = vmul.f32 %v2358_v24, %v453_v62  ;;  %v1008_v2 = vmul.f32 %v2361_v26, %v454_v63  ;;  %v455_v3 = vld [vmem:[%s2329_s4 + $0x7c0] sm:$0xff]  ;;  %v456_v4 = vld [vmem:[%s2329_s4 + $0x7c8] sm:$0xff] }
  0xd4   : > { %1497 = vst [vmem:[%s2379_s18 + $0x700] sm:$0xff] %v985_v17  ;;  %1498 = vst [vmem:[%s2379_s18 + $0x708] sm:$0xff] %v986_v19  ;;  %v457_v5 = vld [vmem:[%s2329_s4 + $0x7d0] sm:$0xff]  ;;  %v1009_v6 = vmul.f32 %v2341_v13, %v455_v3  ;;  %v1010_v7 = vmul.f32 %v2343_v14, %v456_v4  ;;  %v458_v9 = vld [vmem:[%s2329_s4 + $0x7d8] sm:$0xff] }
  0xd5   : > { %1499 = vst [vmem:[%s2379_s18 + $0x710] sm:$0xff] %v987_v21  ;;  %1500 = vst [vmem:[%s2379_s18 + $0x718] sm:$0xff] %v988_v28  ;;  %v1011_v8 = vmul.f32 %v2346_v16, %v457_v5  ;;  %v459_v10 = vld [vmem:[%s2329_s4 + $0x7e0] sm:$0xff]  ;;  %v460_v11 = vld [vmem:[%s2329_s4 + $0x7e8] sm:$0xff]  ;;  %v1012_v12 = vmul.f32 %v2349_v18, %v458_v9 }
  0xd6   : > { %1501 = vst [vmem:[%s2379_s18 + $0x720] sm:$0xff] %v989_v29  ;;  %1502 = vst [vmem:[%s2379_s18 + $0x728] sm:$0xff] %v990_v30  ;;  %v1013_v15 = vmul.f32 %v2352_v20, %v459_v10  ;;  %v1014_v17 = vmul.f32 %v2355_v22, %v460_v11  ;;  %v461_v19 = vld [vmem:[%s2329_s4 + $0x7f0] sm:$0xff]  ;;  %v462_v21 = vld [vmem:[%s2329_s4 + $0x7f8] sm:$0xff] }
  0xd7   : > { %1503 = vst [vmem:[%s2379_s18 + $0x730] sm:$0xff] %v991_v34  ;;  %1504 = vst [vmem:[%s2379_s18 + $0x738] sm:$0xff] %v992_v35  ;;  %v463_v23 = vld [vmem:[%s2329_s4 + $0x800] sm:$0xff]  ;;  %v1015_v25 = vmul.f32 %v2358_v24, %v461_v19  ;;  %v1016_v27 = vmul.f32 %v2361_v26, %v462_v21  ;;  %v464_v29 = vld [vmem:[%s2329_s4 + $0x808] sm:$0xff] }
  0xd8   : > { %1505 = vst [vmem:[%s2379_s18 + $0x740] sm:$0xff] %v993_v36  ;;  %1506 = vst [vmem:[%s2379_s18 + $0x748] sm:$0xff] %v994_v40  ;;  %v1017_v28 = vmul.f32 %v2341_v13, %v463_v23  ;;  %v465_v30 = vld [vmem:[%s2329_s4 + $0x810] sm:$0xff]  ;;  %v466_v31 = vld [vmem:[%s2329_s4 + $0x818] sm:$0xff]  ;;  %v1018_v32 = vmul.f32 %v2343_v14, %v464_v29 }
  0xd9   : > { %1507 = vst [vmem:[%s2379_s18 + $0x750] sm:$0xff] %v995_v41  ;;  %1508 = vst [vmem:[%s2379_s18 + $0x758] sm:$0xff] %v996_v42  ;;  %v1019_v33 = vmul.f32 %v2346_v16, %v465_v30  ;;  %v1020_v34 = vmul.f32 %v2349_v18, %v466_v31  ;;  %v467_v35 = vld [vmem:[%s2329_s4 + $0x820] sm:$0xff]  ;;  %v468_v36 = vld [vmem:[%s2329_s4 + $0x828] sm:$0xff] }
  0xda   : > { %1509 = vst [vmem:[%s2379_s18 + $0x760] sm:$0xff] %v997_v46  ;;  %1510 = vst [vmem:[%s2379_s18 + $0x768] sm:$0xff] %v998_v47  ;;  %v469_v37 = vld [vmem:[%s2329_s4 + $0x830] sm:$0xff]  ;;  %v1021_v38 = vmul.f32 %v2352_v20, %v467_v35  ;;  %v1022_v39 = vmul.f32 %v2355_v22, %v468_v36  ;;  %v470_v41 = vld [vmem:[%s2329_s4 + $0x838] sm:$0xff] }
  0xdb   : > { %1511 = vst [vmem:[%s2379_s18 + $0x770] sm:$0xff] %v999_v48  ;;  %1512 = vst [vmem:[%s2379_s18 + $0x778] sm:$0xff] %v1000_v52  ;;  %v1023_v40 = vmul.f32 %v2358_v24, %v469_v37  ;;  %v471_v42 = vld [vmem:[%s2329_s4 + $0x840] sm:$0xff]  ;;  %v472_v43 = vld [vmem:[%s2329_s4 + $0x848] sm:$0xff]  ;;  %v1024_v44 = vmul.f32 %v2361_v26, %v470_v41 }
  0xdc   : > { %1513 = vst [vmem:[%s2379_s18 + $0x780] sm:$0xff] %v1001_v53  ;;  %1514 = vst [vmem:[%s2379_s18 + $0x788] sm:$0xff] %v1002_v54  ;;  %v1025_v45 = vmul.f32 %v2341_v13, %v471_v42  ;;  %v1026_v46 = vmul.f32 %v2343_v14, %v472_v43  ;;  %v473_v47 = vld [vmem:[%s2329_s4 + $0x850] sm:$0xff]  ;;  %v474_v48 = vld [vmem:[%s2329_s4 + $0x858] sm:$0xff] }
  0xdd   : > { %1515 = vst [vmem:[%s2379_s18 + $0x790] sm:$0xff] %v1003_v58  ;;  %1516 = vst [vmem:[%s2379_s18 + $0x798] sm:$0xff] %v1004_v59  ;;  %v475_v49 = vld [vmem:[%s2329_s4 + $0x860] sm:$0xff]  ;;  %v1027_v50 = vmul.f32 %v2346_v16, %v473_v47  ;;  %v1028_v51 = vmul.f32 %v2349_v18, %v474_v48  ;;  %v476_v53 = vld [vmem:[%s2329_s4 + $0x868] sm:$0xff] }
  0xde   : > { %1517 = vst [vmem:[%s2379_s18 + $0x7a0] sm:$0xff] %v1005_v60  ;;  %1518 = vst [vmem:[%s2379_s18 + $0x7a8] sm:$0xff] %v1006_v0  ;;  %v1029_v52 = vmul.f32 %v2352_v20, %v475_v49  ;;  %v477_v54 = vld [vmem:[%s2329_s4 + $0x870] sm:$0xff]  ;;  %v478_v55 = vld [vmem:[%s2329_s4 + $0x878] sm:$0xff]  ;;  %v1030_v56 = vmul.f32 %v2355_v22, %v476_v53 }
  0xdf   : > { %1519 = vst [vmem:[%s2379_s18 + $0x7b0] sm:$0xff] %v1007_v1  ;;  %1520 = vst [vmem:[%s2379_s18 + $0x7b8] sm:$0xff] %v1008_v2  ;;  %v1031_v57 = vmul.f32 %v2358_v24, %v477_v54  ;;  %v1032_v58 = vmul.f32 %v2361_v26, %v478_v55  ;;  %v479_v59 = vld [vmem:[%s2329_s4 + $0x880] sm:$0xff]  ;;  %v480_v60 = vld [vmem:[%s2329_s4 + $0x888] sm:$0xff] }
  0xe0   : > { %1521 = vst [vmem:[%s2379_s18 + $0x7c0] sm:$0xff] %v1009_v6  ;;  %1522 = vst [vmem:[%s2379_s18 + $0x7c8] sm:$0xff] %v1010_v7  ;;  %v481_v61 = vld [vmem:[%s2329_s4 + $0x890] sm:$0xff]  ;;  %v1033_v62 = vmul.f32 %v2341_v13, %v479_v59  ;;  %v1034_v63 = vmul.f32 %v2343_v14, %v480_v60  ;;  %v482_v1 = vld [vmem:[%s2329_s4 + $0x898] sm:$0xff] }
  0xe1   : > { %1523 = vst [vmem:[%s2379_s18 + $0x7d0] sm:$0xff] %v1011_v8  ;;  %1524 = vst [vmem:[%s2379_s18 + $0x7d8] sm:$0xff] %v1012_v12  ;;  %v1035_v0 = vmul.f32 %v2346_v16, %v481_v61  ;;  %v483_v2 = vld [vmem:[%s2329_s4 + $0x8a0] sm:$0xff]  ;;  %v484_v3 = vld [vmem:[%s2329_s4 + $0x8a8] sm:$0xff]  ;;  %v1036_v4 = vmul.f32 %v2349_v18, %v482_v1 }
  0xe2   : > { %1525 = vst [vmem:[%s2379_s18 + $0x7e0] sm:$0xff] %v1013_v15  ;;  %1526 = vst [vmem:[%s2379_s18 + $0x7e8] sm:$0xff] %v1014_v17  ;;  %v1037_v5 = vmul.f32 %v2352_v20, %v483_v2  ;;  %v1038_v6 = vmul.f32 %v2355_v22, %v484_v3  ;;  %v485_v7 = vld [vmem:[%s2329_s4 + $0x8b0] sm:$0xff]  ;;  %v486_v8 = vld [vmem:[%s2329_s4 + $0x8b8] sm:$0xff] }
  0xe3   : > { %1527 = vst [vmem:[%s2379_s18 + $0x7f0] sm:$0xff] %v1015_v25  ;;  %1528 = vst [vmem:[%s2379_s18 + $0x7f8] sm:$0xff] %v1016_v27  ;;  %v487_v9 = vld [vmem:[%s2329_s4 + $0x8c0] sm:$0xff]  ;;  %v1039_v10 = vmul.f32 %v2358_v24, %v485_v7  ;;  %v1040_v11 = vmul.f32 %v2361_v26, %v486_v8  ;;  %v488_v15 = vld [vmem:[%s2329_s4 + $0x8c8] sm:$0xff] }
  0xe4   : > { %1529 = vst [vmem:[%s2379_s18 + $0x800] sm:$0xff] %v1017_v28  ;;  %1530 = vst [vmem:[%s2379_s18 + $0x808] sm:$0xff] %v1018_v32  ;;  %v1041_v12 = vmul.f32 %v2341_v13, %v487_v9  ;;  %v489_v17 = vld [vmem:[%s2329_s4 + $0x8d0] sm:$0xff]  ;;  %v490_v19 = vld [vmem:[%s2329_s4 + $0x8d8] sm:$0xff]  ;;  %v1042_v21 = vmul.f32 %v2343_v14, %v488_v15 }
  0xe5   : > { %1531 = vst [vmem:[%s2379_s18 + $0x810] sm:$0xff] %v1019_v33  ;;  %1532 = vst [vmem:[%s2379_s18 + $0x818] sm:$0xff] %v1020_v34  ;;  %v1043_v23 = vmul.f32 %v2346_v16, %v489_v17  ;;  %v1044_v25 = vmul.f32 %v2349_v18, %v490_v19  ;;  %v491_v27 = vld [vmem:[%s2329_s4 + $0x8e0] sm:$0xff]  ;;  %v492_v28 = vld [vmem:[%s2329_s4 + $0x8e8] sm:$0xff] }
  0xe6   : > { %1533 = vst [vmem:[%s2379_s18 + $0x820] sm:$0xff] %v1021_v38  ;;  %1534 = vst [vmem:[%s2379_s18 + $0x828] sm:$0xff] %v1022_v39  ;;  %v493_v29 = vld [vmem:[%s2329_s4 + $0x8f0] sm:$0xff]  ;;  %v1045_v30 = vmul.f32 %v2352_v20, %v491_v27  ;;  %v1046_v31 = vmul.f32 %v2355_v22, %v492_v28  ;;  %v494_v33 = vld [vmem:[%s2329_s4 + $0x8f8] sm:$0xff] }
  0xe7   : > { %1535 = vst [vmem:[%s2379_s18 + $0x830] sm:$0xff] %v1023_v40  ;;  %1536 = vst [vmem:[%s2379_s18 + $0x838] sm:$0xff] %v1024_v44  ;;  %v1047_v32 = vmul.f32 %v2358_v24, %v493_v29  ;;  %v495_v34 = vld [vmem:[%s2329_s4 + $0x900] sm:$0xff]  ;;  %v496_v35 = vld [vmem:[%s2329_s4 + $0x908] sm:$0xff]  ;;  %v1048_v36 = vmul.f32 %v2361_v26, %v494_v33 }
  0xe8   : > { %1537 = vst [vmem:[%s2379_s18 + $0x840] sm:$0xff] %v1025_v45  ;;  %1538 = vst [vmem:[%s2379_s18 + $0x848] sm:$0xff] %v1026_v46  ;;  %v1049_v37 = vmul.f32 %v2341_v13, %v495_v34  ;;  %v1050_v38 = vmul.f32 %v2343_v14, %v496_v35  ;;  %v497_v39 = vld [vmem:[%s2329_s4 + $0x910] sm:$0xff]  ;;  %v498_v40 = vld [vmem:[%s2329_s4 + $0x918] sm:$0xff] }
  0xe9   : > { %1539 = vst [vmem:[%s2379_s18 + $0x850] sm:$0xff] %v1027_v50  ;;  %1540 = vst [vmem:[%s2379_s18 + $0x858] sm:$0xff] %v1028_v51  ;;  %v499_v41 = vld [vmem:[%s2329_s4 + $0x920] sm:$0xff]  ;;  %v1051_v42 = vmul.f32 %v2346_v16, %v497_v39  ;;  %v1052_v43 = vmul.f32 %v2349_v18, %v498_v40  ;;  %v500_v45 = vld [vmem:[%s2329_s4 + $0x928] sm:$0xff] }
  0xea   : > { %1541 = vst [vmem:[%s2379_s18 + $0x860] sm:$0xff] %v1029_v52  ;;  %1542 = vst [vmem:[%s2379_s18 + $0x868] sm:$0xff] %v1030_v56  ;;  %v1053_v44 = vmul.f32 %v2352_v20, %v499_v41  ;;  %v501_v46 = vld [vmem:[%s2329_s4 + $0x930] sm:$0xff]  ;;  %v502_v47 = vld [vmem:[%s2329_s4 + $0x938] sm:$0xff]  ;;  %v1054_v48 = vmul.f32 %v2355_v22, %v500_v45 }
  0xeb   : > { %1543 = vst [vmem:[%s2379_s18 + $0x870] sm:$0xff] %v1031_v57  ;;  %1544 = vst [vmem:[%s2379_s18 + $0x878] sm:$0xff] %v1032_v58  ;;  %v1055_v49 = vmul.f32 %v2358_v24, %v501_v46  ;;  %v1056_v50 = vmul.f32 %v2361_v26, %v502_v47  ;;  %v503_v51 = vld [vmem:[%s2329_s4 + $0x940] sm:$0xff]  ;;  %v504_v52 = vld [vmem:[%s2329_s4 + $0x948] sm:$0xff] }
  0xec   : > { %1545 = vst [vmem:[%s2379_s18 + $0x880] sm:$0xff] %v1033_v62  ;;  %1546 = vst [vmem:[%s2379_s18 + $0x888] sm:$0xff] %v1034_v63  ;;  %v505_v53 = vld [vmem:[%s2329_s4 + $0x950] sm:$0xff]  ;;  %v1057_v54 = vmul.f32 %v2341_v13, %v503_v51  ;;  %v1058_v55 = vmul.f32 %v2343_v14, %v504_v52  ;;  %v506_v57 = vld [vmem:[%s2329_s4 + $0x958] sm:$0xff] }
  0xed   : > { %1547 = vst [vmem:[%s2379_s18 + $0x890] sm:$0xff] %v1035_v0  ;;  %1548 = vst [vmem:[%s2379_s18 + $0x898] sm:$0xff] %v1036_v4  ;;  %v1059_v56 = vmul.f32 %v2346_v16, %v505_v53  ;;  %v507_v58 = vld [vmem:[%s2329_s4 + $0x960] sm:$0xff]  ;;  %v508_v59 = vld [vmem:[%s2329_s4 + $0x968] sm:$0xff]  ;;  %v1060_v60 = vmul.f32 %v2349_v18, %v506_v57 }
  0xee   : > { %1549 = vst [vmem:[%s2379_s18 + $0x8a0] sm:$0xff] %v1037_v5  ;;  %1550 = vst [vmem:[%s2379_s18 + $0x8a8] sm:$0xff] %v1038_v6  ;;  %v1061_v61 = vmul.f32 %v2352_v20, %v507_v58  ;;  %v1062_v62 = vmul.f32 %v2355_v22, %v508_v59  ;;  %v509_v63 = vld [vmem:[%s2329_s4 + $0x970] sm:$0xff]  ;;  %v510_v0 = vld [vmem:[%s2329_s4 + $0x978] sm:$0xff] }
  0xef   : > { %1551 = vst [vmem:[%s2379_s18 + $0x8b0] sm:$0xff] %v1039_v10  ;;  %1552 = vst [vmem:[%s2379_s18 + $0x8b8] sm:$0xff] %v1040_v11  ;;  %v511_v1 = vld [vmem:[%s2329_s4 + $0x980] sm:$0xff]  ;;  %v1063_v2 = vmul.f32 %v2358_v24, %v509_v63  ;;  %v1064_v3 = vmul.f32 %v2361_v26, %v510_v0  ;;  %v512_v5 = vld [vmem:[%s2329_s4 + $0x988] sm:$0xff] }
  0xf0   : > { %1553 = vst [vmem:[%s2379_s18 + $0x8c0] sm:$0xff] %v1041_v12  ;;  %1554 = vst [vmem:[%s2379_s18 + $0x8c8] sm:$0xff] %v1042_v21  ;;  %v1065_v4 = vmul.f32 %v2341_v13, %v511_v1  ;;  %v513_v6 = vld [vmem:[%s2329_s4 + $0x990] sm:$0xff]  ;;  %v514_v7 = vld [vmem:[%s2329_s4 + $0x998] sm:$0xff]  ;;  %v1066_v8 = vmul.f32 %v2343_v14, %v512_v5 }
  0xf1   : > { %1555 = vst [vmem:[%s2379_s18 + $0x8d0] sm:$0xff] %v1043_v23  ;;  %1556 = vst [vmem:[%s2379_s18 + $0x8d8] sm:$0xff] %v1044_v25  ;;  %v1067_v9 = vmul.f32 %v2346_v16, %v513_v6  ;;  %v1068_v10 = vmul.f32 %v2349_v18, %v514_v7  ;;  %v515_v11 = vld [vmem:[%s2329_s4 + $0x9a0] sm:$0xff]  ;;  %v516_v12 = vld [vmem:[%s2329_s4 + $0x9a8] sm:$0xff] }
  0xf2   : > { %1557 = vst [vmem:[%s2379_s18 + $0x8e0] sm:$0xff] %v1045_v30  ;;  %1558 = vst [vmem:[%s2379_s18 + $0x8e8] sm:$0xff] %v1046_v31  ;;  %v517_v15 = vld [vmem:[%s2329_s4 + $0x9b0] sm:$0xff]  ;;  %v1069_v17 = vmul.f32 %v2352_v20, %v515_v11  ;;  %v1070_v19 = vmul.f32 %v2355_v22, %v516_v12  ;;  %v518_v23 = vld [vmem:[%s2329_s4 + $0x9b8] sm:$0xff] }
  0xf3   : > { %1559 = vst [vmem:[%s2379_s18 + $0x8f0] sm:$0xff] %v1047_v32  ;;  %1560 = vst [vmem:[%s2379_s18 + $0x8f8] sm:$0xff] %v1048_v36  ;;  %v1071_v21 = vmul.f32 %v2358_v24, %v517_v15  ;;  %v519_v25 = vld [vmem:[%s2329_s4 + $0x9c0] sm:$0xff]  ;;  %v520_v27 = vld [vmem:[%s2329_s4 + $0x9c8] sm:$0xff]  ;;  %v1072_v28 = vmul.f32 %v2361_v26, %v518_v23 }
  0xf4   : > { %1561 = vst [vmem:[%s2379_s18 + $0x900] sm:$0xff] %v1049_v37  ;;  %1562 = vst [vmem:[%s2379_s18 + $0x908] sm:$0xff] %v1050_v38  ;;  %v1073_v29 = vmul.f32 %v2341_v13, %v519_v25  ;;  %v1074_v30 = vmul.f32 %v2343_v14, %v520_v27  ;;  %v521_v31 = vld [vmem:[%s2329_s4 + $0x9d0] sm:$0xff]  ;;  %v522_v32 = vld [vmem:[%s2329_s4 + $0x9d8] sm:$0xff] }
  0xf5   : > { %1563 = vst [vmem:[%s2379_s18 + $0x910] sm:$0xff] %v1051_v42  ;;  %1564 = vst [vmem:[%s2379_s18 + $0x918] sm:$0xff] %v1052_v43  ;;  %v523_v33 = vld [vmem:[%s2329_s4 + $0x9e0] sm:$0xff]  ;;  %v1075_v34 = vmul.f32 %v2346_v16, %v521_v31  ;;  %v1076_v35 = vmul.f32 %v2349_v18, %v522_v32  ;;  %v524_v37 = vld [vmem:[%s2329_s4 + $0x9e8] sm:$0xff] }
  0xf6   : > { %1565 = vst [vmem:[%s2379_s18 + $0x920] sm:$0xff] %v1053_v44  ;;  %1566 = vst [vmem:[%s2379_s18 + $0x928] sm:$0xff] %v1054_v48  ;;  %v1077_v36 = vmul.f32 %v2352_v20, %v523_v33  ;;  %v525_v38 = vld [vmem:[%s2329_s4 + $0x9f0] sm:$0xff]  ;;  %v526_v39 = vld [vmem:[%s2329_s4 + $0x9f8] sm:$0xff]  ;;  %v1078_v40 = vmul.f32 %v2355_v22, %v524_v37 }
  0xf7   : > { %1567 = vst [vmem:[%s2379_s18 + $0x930] sm:$0xff] %v1055_v49  ;;  %1568 = vst [vmem:[%s2379_s18 + $0x938] sm:$0xff] %v1056_v50  ;;  %v1079_v41 = vmul.f32 %v2358_v24, %v525_v38  ;;  %v1080_v42 = vmul.f32 %v2361_v26, %v526_v39  ;;  %v527_v43 = vld [vmem:[%s2329_s4 + $0xa00] sm:$0xff]  ;;  %v528_v44 = vld [vmem:[%s2329_s4 + $0xa08] sm:$0xff] }
  0xf8   : > { %1569 = vst [vmem:[%s2379_s18 + $0x940] sm:$0xff] %v1057_v54  ;;  %1570 = vst [vmem:[%s2379_s18 + $0x948] sm:$0xff] %v1058_v55  ;;  %v529_v45 = vld [vmem:[%s2329_s4 + $0xa10] sm:$0xff]  ;;  %v1081_v46 = vmul.f32 %v2341_v13, %v527_v43  ;;  %v1082_v47 = vmul.f32 %v2343_v14, %v528_v44  ;;  %v530_v49 = vld [vmem:[%s2329_s4 + $0xa18] sm:$0xff] }
  0xf9   : > { %1571 = vst [vmem:[%s2379_s18 + $0x950] sm:$0xff] %v1059_v56  ;;  %1572 = vst [vmem:[%s2379_s18 + $0x958] sm:$0xff] %v1060_v60  ;;  %v1083_v48 = vmul.f32 %v2346_v16, %v529_v45  ;;  %v531_v50 = vld [vmem:[%s2329_s4 + $0xa20] sm:$0xff]  ;;  %v532_v51 = vld [vmem:[%s2329_s4 + $0xa28] sm:$0xff]  ;;  %v1084_v52 = vmul.f32 %v2349_v18, %v530_v49 }
  0xfa   : > { %1573 = vst [vmem:[%s2379_s18 + $0x960] sm:$0xff] %v1061_v61  ;;  %1574 = vst [vmem:[%s2379_s18 + $0x968] sm:$0xff] %v1062_v62  ;;  %v1085_v53 = vmul.f32 %v2352_v20, %v531_v50  ;;  %v1086_v54 = vmul.f32 %v2355_v22, %v532_v51  ;;  %v533_v55 = vld [vmem:[%s2329_s4 + $0xa30] sm:$0xff]  ;;  %v534_v56 = vld [vmem:[%s2329_s4 + $0xa38] sm:$0xff] }
  0xfb   : > { %1575 = vst [vmem:[%s2379_s18 + $0x970] sm:$0xff] %v1063_v2  ;;  %1576 = vst [vmem:[%s2379_s18 + $0x978] sm:$0xff] %v1064_v3  ;;  %v535_v57 = vld [vmem:[%s2329_s4 + $0xa40] sm:$0xff]  ;;  %v1087_v58 = vmul.f32 %v2358_v24, %v533_v55  ;;  %v1088_v59 = vmul.f32 %v2361_v26, %v534_v56  ;;  %v536_v61 = vld [vmem:[%s2329_s4 + $0xa48] sm:$0xff] }
  0xfc   : > { %1577 = vst [vmem:[%s2379_s18 + $0x980] sm:$0xff] %v1065_v4  ;;  %1578 = vst [vmem:[%s2379_s18 + $0x988] sm:$0xff] %v1066_v8  ;;  %v1089_v60 = vmul.f32 %v2341_v13, %v535_v57  ;;  %v537_v62 = vld [vmem:[%s2329_s4 + $0xa50] sm:$0xff]  ;;  %v538_v63 = vld [vmem:[%s2329_s4 + $0xa58] sm:$0xff]  ;;  %v1090_v0 = vmul.f32 %v2343_v14, %v536_v61 }
  0xfd   : > { %1579 = vst [vmem:[%s2379_s18 + $0x990] sm:$0xff] %v1067_v9  ;;  %1580 = vst [vmem:[%s2379_s18 + $0x998] sm:$0xff] %v1068_v10  ;;  %v1091_v1 = vmul.f32 %v2346_v16, %v537_v62  ;;  %v1092_v2 = vmul.f32 %v2349_v18, %v538_v63  ;;  %v539_v3 = vld [vmem:[%s2329_s4 + $0xa60] sm:$0xff]  ;;  %v540_v4 = vld [vmem:[%s2329_s4 + $0xa68] sm:$0xff] }
  0xfe   : > { %1581 = vst [vmem:[%s2379_s18 + $0x9a0] sm:$0xff] %v1069_v17  ;;  %1582 = vst [vmem:[%s2379_s18 + $0x9a8] sm:$0xff] %v1070_v19  ;;  %v541_v5 = vld [vmem:[%s2329_s4 + $0xa70] sm:$0xff]  ;;  %v1093_v6 = vmul.f32 %v2352_v20, %v539_v3  ;;  %v1094_v7 = vmul.f32 %v2355_v22, %v540_v4  ;;  %v542_v9 = vld [vmem:[%s2329_s4 + $0xa78] sm:$0xff] }
  0xff   : > { %1583 = vst [vmem:[%s2379_s18 + $0x9b0] sm:$0xff] %v1071_v21  ;;  %1584 = vst [vmem:[%s2379_s18 + $0x9b8] sm:$0xff] %v1072_v28  ;;  %v1095_v8 = vmul.f32 %v2358_v24, %v541_v5  ;;  %v543_v10 = vld [vmem:[%s2329_s4 + $0xa80] sm:$0xff]  ;;  %v544_v11 = vld [vmem:[%s2329_s4 + $0xa88] sm:$0xff]  ;;  %v1096_v12 = vmul.f32 %v2361_v26, %v542_v9 }
 0x100   : > { %1585 = vst [vmem:[%s2379_s18 + $0x9c0] sm:$0xff] %v1073_v29  ;;  %1586 = vst [vmem:[%s2379_s18 + $0x9c8] sm:$0xff] %v1074_v30  ;;  %v1097_v15 = vmul.f32 %v2341_v13, %v543_v10  ;;  %v1098_v17 = vmul.f32 %v2343_v14, %v544_v11  ;;  %v545_v19 = vld [vmem:[%s2329_s4 + $0xa90] sm:$0xff]  ;;  %v546_v21 = vld [vmem:[%s2329_s4 + $0xa98] sm:$0xff] }
 0x101   : > { %1587 = vst [vmem:[%s2379_s18 + $0x9d0] sm:$0xff] %v1075_v34  ;;  %1588 = vst [vmem:[%s2379_s18 + $0x9d8] sm:$0xff] %v1076_v35  ;;  %v547_v23 = vld [vmem:[%s2329_s4 + $0xaa0] sm:$0xff]  ;;  %v1099_v25 = vmul.f32 %v2346_v16, %v545_v19  ;;  %v1100_v27 = vmul.f32 %v2349_v18, %v546_v21  ;;  %v548_v29 = vld [vmem:[%s2329_s4 + $0xaa8] sm:$0xff] }
 0x102   : > { %1589 = vst [vmem:[%s2379_s18 + $0x9e0] sm:$0xff] %v1077_v36  ;;  %1590 = vst [vmem:[%s2379_s18 + $0x9e8] sm:$0xff] %v1078_v40  ;;  %v1101_v28 = vmul.f32 %v2352_v20, %v547_v23  ;;  %v549_v30 = vld [vmem:[%s2329_s4 + $0xab0] sm:$0xff]  ;;  %v550_v31 = vld [vmem:[%s2329_s4 + $0xab8] sm:$0xff]  ;;  %v1102_v32 = vmul.f32 %v2355_v22, %v548_v29 }
 0x103   : > { %1591 = vst [vmem:[%s2379_s18 + $0x9f0] sm:$0xff] %v1079_v41  ;;  %1592 = vst [vmem:[%s2379_s18 + $0x9f8] sm:$0xff] %v1080_v42  ;;  %v1103_v33 = vmul.f32 %v2358_v24, %v549_v30  ;;  %v1104_v34 = vmul.f32 %v2361_v26, %v550_v31  ;;  %v551_v35 = vld [vmem:[%s2329_s4 + $0xac0] sm:$0xff]  ;;  %v552_v36 = vld [vmem:[%s2329_s4 + $0xac8] sm:$0xff] }
 0x104   : > { %1593 = vst [vmem:[%s2379_s18 + $0xa00] sm:$0xff] %v1081_v46  ;;  %1594 = vst [vmem:[%s2379_s18 + $0xa08] sm:$0xff] %v1082_v47  ;;  %v553_v37 = vld [vmem:[%s2329_s4 + $0xad0] sm:$0xff]  ;;  %v1105_v38 = vmul.f32 %v2341_v13, %v551_v35  ;;  %v1106_v39 = vmul.f32 %v2343_v14, %v552_v36  ;;  %v554_v41 = vld [vmem:[%s2329_s4 + $0xad8] sm:$0xff] }
 0x105   : > { %1595 = vst [vmem:[%s2379_s18 + $0xa10] sm:$0xff] %v1083_v48  ;;  %1596 = vst [vmem:[%s2379_s18 + $0xa18] sm:$0xff] %v1084_v52  ;;  %v1107_v40 = vmul.f32 %v2346_v16, %v553_v37  ;;  %v555_v42 = vld [vmem:[%s2329_s4 + $0xae0] sm:$0xff]  ;;  %v556_v43 = vld [vmem:[%s2329_s4 + $0xae8] sm:$0xff]  ;;  %v1108_v44 = vmul.f32 %v2349_v18, %v554_v41 }
 0x106   : > { %1597 = vst [vmem:[%s2379_s18 + $0xa20] sm:$0xff] %v1085_v53  ;;  %1598 = vst [vmem:[%s2379_s18 + $0xa28] sm:$0xff] %v1086_v54  ;;  %v1109_v45 = vmul.f32 %v2352_v20, %v555_v42  ;;  %v1110_v46 = vmul.f32 %v2355_v22, %v556_v43  ;;  %v557_v47 = vld [vmem:[%s2329_s4 + $0xaf0] sm:$0xff]  ;;  %v558_v48 = vld [vmem:[%s2329_s4 + $0xaf8] sm:$0xff] }
 0x107   : > { %1599 = vst [vmem:[%s2379_s18 + $0xa30] sm:$0xff] %v1087_v58  ;;  %1600 = vst [vmem:[%s2379_s18 + $0xa38] sm:$0xff] %v1088_v59  ;;  %v559_v49 = vld [vmem:[%s2329_s4 + $0xb00] sm:$0xff]  ;;  %v1111_v50 = vmul.f32 %v2358_v24, %v557_v47  ;;  %v1112_v51 = vmul.f32 %v2361_v26, %v558_v48  ;;  %v560_v53 = vld [vmem:[%s2329_s4 + $0xb08] sm:$0xff] }
 0x108   : > { %1601 = vst [vmem:[%s2379_s18 + $0xa40] sm:$0xff] %v1089_v60  ;;  %1602 = vst [vmem:[%s2379_s18 + $0xa48] sm:$0xff] %v1090_v0  ;;  %v1113_v52 = vmul.f32 %v2341_v13, %v559_v49  ;;  %v561_v54 = vld [vmem:[%s2329_s4 + $0xb10] sm:$0xff]  ;;  %v562_v55 = vld [vmem:[%s2329_s4 + $0xb18] sm:$0xff]  ;;  %v1114_v56 = vmul.f32 %v2343_v14, %v560_v53 }
 0x109   : > { %1603 = vst [vmem:[%s2379_s18 + $0xa50] sm:$0xff] %v1091_v1  ;;  %1604 = vst [vmem:[%s2379_s18 + $0xa58] sm:$0xff] %v1092_v2  ;;  %v1115_v57 = vmul.f32 %v2346_v16, %v561_v54  ;;  %v1116_v58 = vmul.f32 %v2349_v18, %v562_v55  ;;  %v563_v59 = vld [vmem:[%s2329_s4 + $0xb20] sm:$0xff]  ;;  %v564_v60 = vld [vmem:[%s2329_s4 + $0xb28] sm:$0xff] }
 0x10a   : > { %1605 = vst [vmem:[%s2379_s18 + $0xa60] sm:$0xff] %v1093_v6  ;;  %1606 = vst [vmem:[%s2379_s18 + $0xa68] sm:$0xff] %v1094_v7  ;;  %v565_v61 = vld [vmem:[%s2329_s4 + $0xb30] sm:$0xff]  ;;  %v1117_v62 = vmul.f32 %v2352_v20, %v563_v59  ;;  %v1118_v63 = vmul.f32 %v2355_v22, %v564_v60  ;;  %v566_v1 = vld [vmem:[%s2329_s4 + $0xb38] sm:$0xff] }
 0x10b   : > { %1607 = vst [vmem:[%s2379_s18 + $0xa70] sm:$0xff] %v1095_v8  ;;  %1608 = vst [vmem:[%s2379_s18 + $0xa78] sm:$0xff] %v1096_v12  ;;  %v1119_v0 = vmul.f32 %v2358_v24, %v565_v61  ;;  %v567_v2 = vld [vmem:[%s2329_s4 + $0xb40] sm:$0xff]  ;;  %v568_v3 = vld [vmem:[%s2329_s4 + $0xb48] sm:$0xff]  ;;  %v1120_v4 = vmul.f32 %v2361_v26, %v566_v1 }
 0x10c   : > { %1609 = vst [vmem:[%s2379_s18 + $0xa80] sm:$0xff] %v1097_v15  ;;  %1610 = vst [vmem:[%s2379_s18 + $0xa88] sm:$0xff] %v1098_v17  ;;  %v1121_v5 = vmul.f32 %v2341_v13, %v567_v2  ;;  %v1122_v6 = vmul.f32 %v2343_v14, %v568_v3  ;;  %v569_v7 = vld [vmem:[%s2329_s4 + $0xb50] sm:$0xff]  ;;  %v570_v8 = vld [vmem:[%s2329_s4 + $0xb58] sm:$0xff] }
 0x10d   : > { %1611 = vst [vmem:[%s2379_s18 + $0xa90] sm:$0xff] %v1099_v25  ;;  %1612 = vst [vmem:[%s2379_s18 + $0xa98] sm:$0xff] %v1100_v27  ;;  %v571_v9 = vld [vmem:[%s2329_s4 + $0xb60] sm:$0xff]  ;;  %v1123_v10 = vmul.f32 %v2346_v16, %v569_v7  ;;  %v1124_v11 = vmul.f32 %v2349_v18, %v570_v8  ;;  %v572_v15 = vld [vmem:[%s2329_s4 + $0xb68] sm:$0xff] }
 0x10e   : > { %1613 = vst [vmem:[%s2379_s18 + $0xaa0] sm:$0xff] %v1101_v28  ;;  %1614 = vst [vmem:[%s2379_s18 + $0xaa8] sm:$0xff] %v1102_v32  ;;  %v1125_v12 = vmul.f32 %v2352_v20, %v571_v9  ;;  %v573_v17 = vld [vmem:[%s2329_s4 + $0xb70] sm:$0xff]  ;;  %v574_v19 = vld [vmem:[%s2329_s4 + $0xb78] sm:$0xff]  ;;  %v1126_v21 = vmul.f32 %v2355_v22, %v572_v15 }
 0x10f   : > { %1615 = vst [vmem:[%s2379_s18 + $0xab0] sm:$0xff] %v1103_v33  ;;  %1616 = vst [vmem:[%s2379_s18 + $0xab8] sm:$0xff] %v1104_v34  ;;  %v1127_v23 = vmul.f32 %v2358_v24, %v573_v17  ;;  %v1128_v25 = vmul.f32 %v2361_v26, %v574_v19  ;;  %v575_v27 = vld [vmem:[%s2329_s4 + $0xb80] sm:$0xff]  ;;  %v576_v28 = vld [vmem:[%s2329_s4 + $0xb88] sm:$0xff] }
 0x110   : > { %1617 = vst [vmem:[%s2379_s18 + $0xac0] sm:$0xff] %v1105_v38  ;;  %1618 = vst [vmem:[%s2379_s18 + $0xac8] sm:$0xff] %v1106_v39  ;;  %v577_v29 = vld [vmem:[%s2329_s4 + $0xb90] sm:$0xff]  ;;  %v1129_v30 = vmul.f32 %v2341_v13, %v575_v27  ;;  %v1130_v31 = vmul.f32 %v2343_v14, %v576_v28  ;;  %v578_v33 = vld [vmem:[%s2329_s4 + $0xb98] sm:$0xff] }
 0x111   : > { %1619 = vst [vmem:[%s2379_s18 + $0xad0] sm:$0xff] %v1107_v40  ;;  %1620 = vst [vmem:[%s2379_s18 + $0xad8] sm:$0xff] %v1108_v44  ;;  %v1131_v32 = vmul.f32 %v2346_v16, %v577_v29  ;;  %v579_v34 = vld [vmem:[%s2329_s4 + $0xba0] sm:$0xff]  ;;  %v580_v35 = vld [vmem:[%s2329_s4 + $0xba8] sm:$0xff]  ;;  %v1132_v36 = vmul.f32 %v2349_v18, %v578_v33 }
 0x112   : > { %1621 = vst [vmem:[%s2379_s18 + $0xae0] sm:$0xff] %v1109_v45  ;;  %1622 = vst [vmem:[%s2379_s18 + $0xae8] sm:$0xff] %v1110_v46  ;;  %v1133_v37 = vmul.f32 %v2352_v20, %v579_v34  ;;  %v1134_v38 = vmul.f32 %v2355_v22, %v580_v35  ;;  %v581_v39 = vld [vmem:[%s2329_s4 + $0xbb0] sm:$0xff]  ;;  %v582_v40 = vld [vmem:[%s2329_s4 + $0xbb8] sm:$0xff] }
 0x113   : > { %1623 = vst [vmem:[%s2379_s18 + $0xaf0] sm:$0xff] %v1111_v50  ;;  %1624 = vst [vmem:[%s2379_s18 + $0xaf8] sm:$0xff] %v1112_v51  ;;  %v583_v41 = vld [vmem:[%s2329_s4 + $0xbc0] sm:$0xff]  ;;  %v1135_v42 = vmul.f32 %v2358_v24, %v581_v39  ;;  %v1136_v43 = vmul.f32 %v2361_v26, %v582_v40  ;;  %v584_v45 = vld [vmem:[%s2329_s4 + $0xbc8] sm:$0xff] }
 0x114   : > { %1625 = vst [vmem:[%s2379_s18 + $0xb00] sm:$0xff] %v1113_v52  ;;  %1626 = vst [vmem:[%s2379_s18 + $0xb08] sm:$0xff] %v1114_v56  ;;  %v1137_v44 = vmul.f32 %v2341_v13, %v583_v41  ;;  %v585_v46 = vld [vmem:[%s2329_s4 + $0xbd0] sm:$0xff]  ;;  %v586_v47 = vld [vmem:[%s2329_s4 + $0xbd8] sm:$0xff]  ;;  %v1138_v48 = vmul.f32 %v2343_v14, %v584_v45 }
 0x115   : > { %1627 = vst [vmem:[%s2379_s18 + $0xb10] sm:$0xff] %v1115_v57  ;;  %1628 = vst [vmem:[%s2379_s18 + $0xb18] sm:$0xff] %v1116_v58  ;;  %v1139_v49 = vmul.f32 %v2346_v16, %v585_v46  ;;  %v1140_v50 = vmul.f32 %v2349_v18, %v586_v47  ;;  %v587_v51 = vld [vmem:[%s2329_s4 + $0xbe0] sm:$0xff]  ;;  %v588_v52 = vld [vmem:[%s2329_s4 + $0xbe8] sm:$0xff] }
 0x116   : > { %1629 = vst [vmem:[%s2379_s18 + $0xb20] sm:$0xff] %v1117_v62  ;;  %1630 = vst [vmem:[%s2379_s18 + $0xb28] sm:$0xff] %v1118_v63  ;;  %v589_v53 = vld [vmem:[%s2329_s4 + $0xbf0] sm:$0xff]  ;;  %v1141_v54 = vmul.f32 %v2352_v20, %v587_v51  ;;  %v1142_v55 = vmul.f32 %v2355_v22, %v588_v52  ;;  %v590_v57 = vld [vmem:[%s2329_s4 + $0xbf8] sm:$0xff] }
 0x117   : > { %1631 = vst [vmem:[%s2379_s18 + $0xb30] sm:$0xff] %v1119_v0  ;;  %1632 = vst [vmem:[%s2379_s18 + $0xb38] sm:$0xff] %v1120_v4  ;;  %v1143_v56 = vmul.f32 %v2358_v24, %v589_v53  ;;  %v591_v58 = vld [vmem:[%s2329_s4 + $0xc00] sm:$0xff]  ;;  %v592_v59 = vld [vmem:[%s2329_s4 + $0xc08] sm:$0xff]  ;;  %v1144_v60 = vmul.f32 %v2361_v26, %v590_v57 }
 0x118   : > { %1633 = vst [vmem:[%s2379_s18 + $0xb40] sm:$0xff] %v1121_v5  ;;  %1634 = vst [vmem:[%s2379_s18 + $0xb48] sm:$0xff] %v1122_v6  ;;  %v1145_v61 = vmul.f32 %v2341_v13, %v591_v58  ;;  %v1146_v62 = vmul.f32 %v2343_v14, %v592_v59  ;;  %v593_v63 = vld [vmem:[%s2329_s4 + $0xc10] sm:$0xff]  ;;  %v594_v0 = vld [vmem:[%s2329_s4 + $0xc18] sm:$0xff] }
 0x119   : > { %1635 = vst [vmem:[%s2379_s18 + $0xb50] sm:$0xff] %v1123_v10  ;;  %1636 = vst [vmem:[%s2379_s18 + $0xb58] sm:$0xff] %v1124_v11  ;;  %v595_v1 = vld [vmem:[%s2329_s4 + $0xc20] sm:$0xff]  ;;  %v1147_v2 = vmul.f32 %v2346_v16, %v593_v63  ;;  %v1148_v3 = vmul.f32 %v2349_v18, %v594_v0  ;;  %v596_v5 = vld [vmem:[%s2329_s4 + $0xc28] sm:$0xff] }
 0x11a   : > { %1637 = vst [vmem:[%s2379_s18 + $0xb60] sm:$0xff] %v1125_v12  ;;  %1638 = vst [vmem:[%s2379_s18 + $0xb68] sm:$0xff] %v1126_v21  ;;  %v1149_v4 = vmul.f32 %v2352_v20, %v595_v1  ;;  %v597_v6 = vld [vmem:[%s2329_s4 + $0xc30] sm:$0xff]  ;;  %v598_v7 = vld [vmem:[%s2329_s4 + $0xc38] sm:$0xff]  ;;  %v1150_v8 = vmul.f32 %v2355_v22, %v596_v5 }
 0x11b   : > { %1639 = vst [vmem:[%s2379_s18 + $0xb70] sm:$0xff] %v1127_v23  ;;  %1640 = vst [vmem:[%s2379_s18 + $0xb78] sm:$0xff] %v1128_v25  ;;  %v1151_v9 = vmul.f32 %v2358_v24, %v597_v6  ;;  %v1152_v10 = vmul.f32 %v2361_v26, %v598_v7  ;;  %v599_v11 = vld [vmem:[%s2329_s4 + $0xc40] sm:$0xff]  ;;  %v600_v12 = vld [vmem:[%s2329_s4 + $0xc48] sm:$0xff] }
 0x11c   : > { %1641 = vst [vmem:[%s2379_s18 + $0xb80] sm:$0xff] %v1129_v30  ;;  %1642 = vst [vmem:[%s2379_s18 + $0xb88] sm:$0xff] %v1130_v31  ;;  %v601_v15 = vld [vmem:[%s2329_s4 + $0xc50] sm:$0xff]  ;;  %v1153_v17 = vmul.f32 %v2341_v13, %v599_v11  ;;  %v1154_v19 = vmul.f32 %v2343_v14, %v600_v12  ;;  %v602_v23 = vld [vmem:[%s2329_s4 + $0xc58] sm:$0xff] }
 0x11d   : > { %1643 = vst [vmem:[%s2379_s18 + $0xb90] sm:$0xff] %v1131_v32  ;;  %1644 = vst [vmem:[%s2379_s18 + $0xb98] sm:$0xff] %v1132_v36  ;;  %v1155_v21 = vmul.f32 %v2346_v16, %v601_v15  ;;  %v603_v25 = vld [vmem:[%s2329_s4 + $0xc60] sm:$0xff]  ;;  %v604_v27 = vld [vmem:[%s2329_s4 + $0xc68] sm:$0xff]  ;;  %v1156_v28 = vmul.f32 %v2349_v18, %v602_v23 }
 0x11e   : > { %1645 = vst [vmem:[%s2379_s18 + $0xba0] sm:$0xff] %v1133_v37  ;;  %1646 = vst [vmem:[%s2379_s18 + $0xba8] sm:$0xff] %v1134_v38  ;;  %v1157_v29 = vmul.f32 %v2352_v20, %v603_v25  ;;  %v1158_v30 = vmul.f32 %v2355_v22, %v604_v27  ;;  %v605_v31 = vld [vmem:[%s2329_s4 + $0xc70] sm:$0xff]  ;;  %v606_v32 = vld [vmem:[%s2329_s4 + $0xc78] sm:$0xff] }
 0x11f   : > { %1647 = vst [vmem:[%s2379_s18 + $0xbb0] sm:$0xff] %v1135_v42  ;;  %1648 = vst [vmem:[%s2379_s18 + $0xbb8] sm:$0xff] %v1136_v43  ;;  %v607_v33 = vld [vmem:[%s2329_s4 + $0xc80] sm:$0xff]  ;;  %v1159_v34 = vmul.f32 %v2358_v24, %v605_v31  ;;  %v1160_v35 = vmul.f32 %v2361_v26, %v606_v32  ;;  %v608_v37 = vld [vmem:[%s2329_s4 + $0xc88] sm:$0xff] }
 0x120   : > { %1649 = vst [vmem:[%s2379_s18 + $0xbc0] sm:$0xff] %v1137_v44  ;;  %1650 = vst [vmem:[%s2379_s18 + $0xbc8] sm:$0xff] %v1138_v48  ;;  %v1161_v36 = vmul.f32 %v2341_v13, %v607_v33  ;;  %v609_v38 = vld [vmem:[%s2329_s4 + $0xc90] sm:$0xff]  ;;  %v610_v39 = vld [vmem:[%s2329_s4 + $0xc98] sm:$0xff]  ;;  %v1162_v40 = vmul.f32 %v2343_v14, %v608_v37 }
 0x121   : > { %1651 = vst [vmem:[%s2379_s18 + $0xbd0] sm:$0xff] %v1139_v49  ;;  %1652 = vst [vmem:[%s2379_s18 + $0xbd8] sm:$0xff] %v1140_v50  ;;  %v1163_v41 = vmul.f32 %v2346_v16, %v609_v38  ;;  %v1164_v42 = vmul.f32 %v2349_v18, %v610_v39  ;;  %v611_v43 = vld [vmem:[%s2329_s4 + $0xca0] sm:$0xff]  ;;  %v612_v44 = vld [vmem:[%s2329_s4 + $0xca8] sm:$0xff] }
 0x122   : > { %1653 = vst [vmem:[%s2379_s18 + $0xbe0] sm:$0xff] %v1141_v54  ;;  %1654 = vst [vmem:[%s2379_s18 + $0xbe8] sm:$0xff] %v1142_v55  ;;  %v613_v45 = vld [vmem:[%s2329_s4 + $0xcb0] sm:$0xff]  ;;  %v1165_v46 = vmul.f32 %v2352_v20, %v611_v43  ;;  %v1166_v47 = vmul.f32 %v2355_v22, %v612_v44  ;;  %v614_v49 = vld [vmem:[%s2329_s4 + $0xcb8] sm:$0xff] }
 0x123   : > { %1655 = vst [vmem:[%s2379_s18 + $0xbf0] sm:$0xff] %v1143_v56  ;;  %1656 = vst [vmem:[%s2379_s18 + $0xbf8] sm:$0xff] %v1144_v60  ;;  %v1167_v48 = vmul.f32 %v2358_v24, %v613_v45  ;;  %v615_v50 = vld [vmem:[%s2329_s4 + $0xcc0] sm:$0xff]  ;;  %v616_v51 = vld [vmem:[%s2329_s4 + $0xcc8] sm:$0xff]  ;;  %v1168_v52 = vmul.f32 %v2361_v26, %v614_v49 }
 0x124   : > { %1657 = vst [vmem:[%s2379_s18 + $0xc00] sm:$0xff] %v1145_v61  ;;  %1658 = vst [vmem:[%s2379_s18 + $0xc08] sm:$0xff] %v1146_v62  ;;  %v1169_v53 = vmul.f32 %v2341_v13, %v615_v50  ;;  %v1170_v54 = vmul.f32 %v2343_v14, %v616_v51  ;;  %v617_v55 = vld [vmem:[%s2329_s4 + $0xcd0] sm:$0xff]  ;;  %v618_v56 = vld [vmem:[%s2329_s4 + $0xcd8] sm:$0xff] }
 0x125   : > { %1659 = vst [vmem:[%s2379_s18 + $0xc10] sm:$0xff] %v1147_v2  ;;  %1660 = vst [vmem:[%s2379_s18 + $0xc18] sm:$0xff] %v1148_v3  ;;  %v619_v57 = vld [vmem:[%s2329_s4 + $0xce0] sm:$0xff]  ;;  %v1171_v58 = vmul.f32 %v2346_v16, %v617_v55  ;;  %v1172_v59 = vmul.f32 %v2349_v18, %v618_v56  ;;  %v620_v61 = vld [vmem:[%s2329_s4 + $0xce8] sm:$0xff] }
 0x126   : > { %1661 = vst [vmem:[%s2379_s18 + $0xc20] sm:$0xff] %v1149_v4  ;;  %1662 = vst [vmem:[%s2379_s18 + $0xc28] sm:$0xff] %v1150_v8  ;;  %v1173_v60 = vmul.f32 %v2352_v20, %v619_v57  ;;  %v621_v62 = vld [vmem:[%s2329_s4 + $0xcf0] sm:$0xff]  ;;  %v622_v63 = vld [vmem:[%s2329_s4 + $0xcf8] sm:$0xff]  ;;  %v1174_v0 = vmul.f32 %v2355_v22, %v620_v61 }
 0x127   : > { %1663 = vst [vmem:[%s2379_s18 + $0xc30] sm:$0xff] %v1151_v9  ;;  %1664 = vst [vmem:[%s2379_s18 + $0xc38] sm:$0xff] %v1152_v10  ;;  %v1175_v1 = vmul.f32 %v2358_v24, %v621_v62  ;;  %v1176_v2 = vmul.f32 %v2361_v26, %v622_v63  ;;  %v623_v3 = vld [vmem:[%s2329_s4 + $0xd00] sm:$0xff]  ;;  %v624_v4 = vld [vmem:[%s2329_s4 + $0xd08] sm:$0xff] }
 0x128   : > { %1665 = vst [vmem:[%s2379_s18 + $0xc40] sm:$0xff] %v1153_v17  ;;  %1666 = vst [vmem:[%s2379_s18 + $0xc48] sm:$0xff] %v1154_v19  ;;  %v625_v5 = vld [vmem:[%s2329_s4 + $0xd10] sm:$0xff]  ;;  %v1177_v6 = vmul.f32 %v2341_v13, %v623_v3  ;;  %v1178_v7 = vmul.f32 %v2343_v14, %v624_v4  ;;  %v626_v9 = vld [vmem:[%s2329_s4 + $0xd18] sm:$0xff] }
 0x129   : > { %1667 = vst [vmem:[%s2379_s18 + $0xc50] sm:$0xff] %v1155_v21  ;;  %1668 = vst [vmem:[%s2379_s18 + $0xc58] sm:$0xff] %v1156_v28  ;;  %v1179_v8 = vmul.f32 %v2346_v16, %v625_v5  ;;  %v627_v10 = vld [vmem:[%s2329_s4 + $0xd20] sm:$0xff]  ;;  %v628_v11 = vld [vmem:[%s2329_s4 + $0xd28] sm:$0xff]  ;;  %v1180_v12 = vmul.f32 %v2349_v18, %v626_v9 }
 0x12a   : > { %1669 = vst [vmem:[%s2379_s18 + $0xc60] sm:$0xff] %v1157_v29  ;;  %1670 = vst [vmem:[%s2379_s18 + $0xc68] sm:$0xff] %v1158_v30  ;;  %v1181_v15 = vmul.f32 %v2352_v20, %v627_v10  ;;  %v1182_v17 = vmul.f32 %v2355_v22, %v628_v11  ;;  %v629_v19 = vld [vmem:[%s2329_s4 + $0xd30] sm:$0xff]  ;;  %v630_v21 = vld [vmem:[%s2329_s4 + $0xd38] sm:$0xff] }
 0x12b   : > { %1671 = vst [vmem:[%s2379_s18 + $0xc70] sm:$0xff] %v1159_v34  ;;  %1672 = vst [vmem:[%s2379_s18 + $0xc78] sm:$0xff] %v1160_v35  ;;  %v631_v23 = vld [vmem:[%s2329_s4 + $0xd40] sm:$0xff]  ;;  %v1183_v25 = vmul.f32 %v2358_v24, %v629_v19  ;;  %v1184_v27 = vmul.f32 %v2361_v26, %v630_v21  ;;  %v632_v29 = vld [vmem:[%s2329_s4 + $0xd48] sm:$0xff] }
 0x12c   : > { %1673 = vst [vmem:[%s2379_s18 + $0xc80] sm:$0xff] %v1161_v36  ;;  %1674 = vst [vmem:[%s2379_s18 + $0xc88] sm:$0xff] %v1162_v40  ;;  %v1185_v28 = vmul.f32 %v2341_v13, %v631_v23  ;;  %v633_v30 = vld [vmem:[%s2329_s4 + $0xd50] sm:$0xff]  ;;  %v634_v31 = vld [vmem:[%s2329_s4 + $0xd58] sm:$0xff]  ;;  %v1186_v32 = vmul.f32 %v2343_v14, %v632_v29 }
 0x12d   : > { %1675 = vst [vmem:[%s2379_s18 + $0xc90] sm:$0xff] %v1163_v41  ;;  %1676 = vst [vmem:[%s2379_s18 + $0xc98] sm:$0xff] %v1164_v42  ;;  %v1187_v33 = vmul.f32 %v2346_v16, %v633_v30  ;;  %v1188_v34 = vmul.f32 %v2349_v18, %v634_v31  ;;  %v635_v35 = vld [vmem:[%s2329_s4 + $0xd60] sm:$0xff]  ;;  %v636_v36 = vld [vmem:[%s2329_s4 + $0xd68] sm:$0xff] }
 0x12e   : > { %1677 = vst [vmem:[%s2379_s18 + $0xca0] sm:$0xff] %v1165_v46  ;;  %1678 = vst [vmem:[%s2379_s18 + $0xca8] sm:$0xff] %v1166_v47  ;;  %v637_v37 = vld [vmem:[%s2329_s4 + $0xd70] sm:$0xff]  ;;  %v1189_v38 = vmul.f32 %v2352_v20, %v635_v35  ;;  %v1190_v39 = vmul.f32 %v2355_v22, %v636_v36  ;;  %v638_v41 = vld [vmem:[%s2329_s4 + $0xd78] sm:$0xff] }
 0x12f   : > { %1679 = vst [vmem:[%s2379_s18 + $0xcb0] sm:$0xff] %v1167_v48  ;;  %1680 = vst [vmem:[%s2379_s18 + $0xcb8] sm:$0xff] %v1168_v52  ;;  %v1191_v40 = vmul.f32 %v2358_v24, %v637_v37  ;;  %v639_v42 = vld [vmem:[%s2329_s4 + $0xd80] sm:$0xff]  ;;  %v640_v43 = vld [vmem:[%s2329_s4 + $0xd88] sm:$0xff]  ;;  %v1192_v44 = vmul.f32 %v2361_v26, %v638_v41 }
 0x130   : > { %1681 = vst [vmem:[%s2379_s18 + $0xcc0] sm:$0xff] %v1169_v53  ;;  %1682 = vst [vmem:[%s2379_s18 + $0xcc8] sm:$0xff] %v1170_v54  ;;  %v1193_v45 = vmul.f32 %v2341_v13, %v639_v42  ;;  %v1194_v46 = vmul.f32 %v2343_v14, %v640_v43  ;;  %v641_v47 = vld [vmem:[%s2329_s4 + $0xd90] sm:$0xff]  ;;  %v642_v48 = vld [vmem:[%s2329_s4 + $0xd98] sm:$0xff] }
 0x131   : > { %1683 = vst [vmem:[%s2379_s18 + $0xcd0] sm:$0xff] %v1171_v58  ;;  %1684 = vst [vmem:[%s2379_s18 + $0xcd8] sm:$0xff] %v1172_v59  ;;  %v643_v49 = vld [vmem:[%s2329_s4 + $0xda0] sm:$0xff]  ;;  %v1195_v50 = vmul.f32 %v2346_v16, %v641_v47  ;;  %v1196_v51 = vmul.f32 %v2349_v18, %v642_v48  ;;  %v644_v53 = vld [vmem:[%s2329_s4 + $0xda8] sm:$0xff] }
 0x132   : > { %1685 = vst [vmem:[%s2379_s18 + $0xce0] sm:$0xff] %v1173_v60  ;;  %1686 = vst [vmem:[%s2379_s18 + $0xce8] sm:$0xff] %v1174_v0  ;;  %v1197_v52 = vmul.f32 %v2352_v20, %v643_v49  ;;  %v645_v54 = vld [vmem:[%s2329_s4 + $0xdb0] sm:$0xff]  ;;  %v646_v55 = vld [vmem:[%s2329_s4 + $0xdb8] sm:$0xff]  ;;  %v1198_v56 = vmul.f32 %v2355_v22, %v644_v53 }
 0x133   : > { %1687 = vst [vmem:[%s2379_s18 + $0xcf0] sm:$0xff] %v1175_v1  ;;  %1688 = vst [vmem:[%s2379_s18 + $0xcf8] sm:$0xff] %v1176_v2  ;;  %v1199_v57 = vmul.f32 %v2358_v24, %v645_v54  ;;  %v1200_v58 = vmul.f32 %v2361_v26, %v646_v55  ;;  %v647_v59 = vld [vmem:[%s2329_s4 + $0xdc0] sm:$0xff]  ;;  %v648_v60 = vld [vmem:[%s2329_s4 + $0xdc8] sm:$0xff] }
 0x134   : > { %1689 = vst [vmem:[%s2379_s18 + $0xd00] sm:$0xff] %v1177_v6  ;;  %1690 = vst [vmem:[%s2379_s18 + $0xd08] sm:$0xff] %v1178_v7  ;;  %v649_v61 = vld [vmem:[%s2329_s4 + $0xdd0] sm:$0xff]  ;;  %v1201_v62 = vmul.f32 %v2341_v13, %v647_v59  ;;  %v1202_v63 = vmul.f32 %v2343_v14, %v648_v60  ;;  %v650_v1 = vld [vmem:[%s2329_s4 + $0xdd8] sm:$0xff] }
 0x135   : > { %1691 = vst [vmem:[%s2379_s18 + $0xd10] sm:$0xff] %v1179_v8  ;;  %1692 = vst [vmem:[%s2379_s18 + $0xd18] sm:$0xff] %v1180_v12  ;;  %v1203_v0 = vmul.f32 %v2346_v16, %v649_v61  ;;  %v651_v2 = vld [vmem:[%s2329_s4 + $0xde0] sm:$0xff]  ;;  %v652_v3 = vld [vmem:[%s2329_s4 + $0xde8] sm:$0xff]  ;;  %v1204_v4 = vmul.f32 %v2349_v18, %v650_v1 }
 0x136   : > { %1693 = vst [vmem:[%s2379_s18 + $0xd20] sm:$0xff] %v1181_v15  ;;  %1694 = vst [vmem:[%s2379_s18 + $0xd28] sm:$0xff] %v1182_v17  ;;  %v1205_v5 = vmul.f32 %v2352_v20, %v651_v2  ;;  %v1206_v6 = vmul.f32 %v2355_v22, %v652_v3  ;;  %v653_v7 = vld [vmem:[%s2329_s4 + $0xdf0] sm:$0xff]  ;;  %v654_v8 = vld [vmem:[%s2329_s4 + $0xdf8] sm:$0xff] }
 0x137   : > { %1695 = vst [vmem:[%s2379_s18 + $0xd30] sm:$0xff] %v1183_v25  ;;  %1696 = vst [vmem:[%s2379_s18 + $0xd38] sm:$0xff] %v1184_v27  ;;  %v655_v9 = vld [vmem:[%s2329_s4 + $0xe00] sm:$0xff]  ;;  %v1207_v10 = vmul.f32 %v2358_v24, %v653_v7  ;;  %v1208_v11 = vmul.f32 %v2361_v26, %v654_v8  ;;  %v656_v15 = vld [vmem:[%s2329_s4 + $0xe08] sm:$0xff] }
 0x138   : > { %1697 = vst [vmem:[%s2379_s18 + $0xd40] sm:$0xff] %v1185_v28  ;;  %1698 = vst [vmem:[%s2379_s18 + $0xd48] sm:$0xff] %v1186_v32  ;;  %v1209_v12 = vmul.f32 %v2341_v13, %v655_v9  ;;  %v657_v17 = vld [vmem:[%s2329_s4 + $0xe10] sm:$0xff]  ;;  %v658_v19 = vld [vmem:[%s2329_s4 + $0xe18] sm:$0xff]  ;;  %v1210_v21 = vmul.f32 %v2343_v14, %v656_v15 }
 0x139   : > { %1699 = vst [vmem:[%s2379_s18 + $0xd50] sm:$0xff] %v1187_v33  ;;  %1700 = vst [vmem:[%s2379_s18 + $0xd58] sm:$0xff] %v1188_v34  ;;  %v1211_v23 = vmul.f32 %v2346_v16, %v657_v17  ;;  %v1212_v25 = vmul.f32 %v2349_v18, %v658_v19  ;;  %v659_v27 = vld [vmem:[%s2329_s4 + $0xe20] sm:$0xff]  ;;  %v660_v28 = vld [vmem:[%s2329_s4 + $0xe28] sm:$0xff] }
 0x13a   : > { %1701 = vst [vmem:[%s2379_s18 + $0xd60] sm:$0xff] %v1189_v38  ;;  %1702 = vst [vmem:[%s2379_s18 + $0xd68] sm:$0xff] %v1190_v39  ;;  %v661_v29 = vld [vmem:[%s2329_s4 + $0xe30] sm:$0xff]  ;;  %v1213_v30 = vmul.f32 %v2352_v20, %v659_v27  ;;  %v1214_v31 = vmul.f32 %v2355_v22, %v660_v28  ;;  %v662_v33 = vld [vmem:[%s2329_s4 + $0xe38] sm:$0xff] }
 0x13b   : > { %1703 = vst [vmem:[%s2379_s18 + $0xd70] sm:$0xff] %v1191_v40  ;;  %1704 = vst [vmem:[%s2379_s18 + $0xd78] sm:$0xff] %v1192_v44  ;;  %v1215_v32 = vmul.f32 %v2358_v24, %v661_v29  ;;  %v663_v34 = vld [vmem:[%s2329_s4 + $0xe40] sm:$0xff]  ;;  %v664_v35 = vld [vmem:[%s2329_s4 + $0xe48] sm:$0xff]  ;;  %v1216_v36 = vmul.f32 %v2361_v26, %v662_v33 }
 0x13c   : > { %1705 = vst [vmem:[%s2379_s18 + $0xd80] sm:$0xff] %v1193_v45  ;;  %1706 = vst [vmem:[%s2379_s18 + $0xd88] sm:$0xff] %v1194_v46  ;;  %v1217_v37 = vmul.f32 %v2341_v13, %v663_v34  ;;  %v1218_v38 = vmul.f32 %v2343_v14, %v664_v35  ;;  %v665_v39 = vld [vmem:[%s2329_s4 + $0xe50] sm:$0xff]  ;;  %v666_v40 = vld [vmem:[%s2329_s4 + $0xe58] sm:$0xff] }
 0x13d   : > { %1707 = vst [vmem:[%s2379_s18 + $0xd90] sm:$0xff] %v1195_v50  ;;  %1708 = vst [vmem:[%s2379_s18 + $0xd98] sm:$0xff] %v1196_v51  ;;  %v667_v41 = vld [vmem:[%s2329_s4 + $0xe60] sm:$0xff]  ;;  %v1219_v42 = vmul.f32 %v2346_v16, %v665_v39  ;;  %v1220_v43 = vmul.f32 %v2349_v18, %v666_v40  ;;  %v668_v45 = vld [vmem:[%s2329_s4 + $0xe68] sm:$0xff] }
 0x13e   : > { %1709 = vst [vmem:[%s2379_s18 + $0xda0] sm:$0xff] %v1197_v52  ;;  %1710 = vst [vmem:[%s2379_s18 + $0xda8] sm:$0xff] %v1198_v56  ;;  %v1221_v44 = vmul.f32 %v2352_v20, %v667_v41  ;;  %v669_v46 = vld [vmem:[%s2329_s4 + $0xe70] sm:$0xff]  ;;  %v670_v47 = vld [vmem:[%s2329_s4 + $0xe78] sm:$0xff]  ;;  %v1222_v48 = vmul.f32 %v2355_v22, %v668_v45 }
 0x13f   : > { %1711 = vst [vmem:[%s2379_s18 + $0xdb0] sm:$0xff] %v1199_v57  ;;  %1712 = vst [vmem:[%s2379_s18 + $0xdb8] sm:$0xff] %v1200_v58  ;;  %v1223_v49 = vmul.f32 %v2358_v24, %v669_v46  ;;  %v1224_v50 = vmul.f32 %v2361_v26, %v670_v47  ;;  %v671_v51 = vld [vmem:[%s2329_s4 + $0xe80] sm:$0xff]  ;;  %v672_v52 = vld [vmem:[%s2329_s4 + $0xe88] sm:$0xff] }
 0x140   : > { %1713 = vst [vmem:[%s2379_s18 + $0xdc0] sm:$0xff] %v1201_v62  ;;  %1714 = vst [vmem:[%s2379_s18 + $0xdc8] sm:$0xff] %v1202_v63  ;;  %v673_v53 = vld [vmem:[%s2329_s4 + $0xe90] sm:$0xff]  ;;  %v1225_v54 = vmul.f32 %v2341_v13, %v671_v51  ;;  %v1226_v55 = vmul.f32 %v2343_v14, %v672_v52  ;;  %v674_v57 = vld [vmem:[%s2329_s4 + $0xe98] sm:$0xff] }
 0x141   : > { %1715 = vst [vmem:[%s2379_s18 + $0xdd0] sm:$0xff] %v1203_v0  ;;  %1716 = vst [vmem:[%s2379_s18 + $0xdd8] sm:$0xff] %v1204_v4  ;;  %v1227_v56 = vmul.f32 %v2346_v16, %v673_v53  ;;  %v675_v58 = vld [vmem:[%s2329_s4 + $0xea0] sm:$0xff]  ;;  %v676_v59 = vld [vmem:[%s2329_s4 + $0xea8] sm:$0xff]  ;;  %v1228_v60 = vmul.f32 %v2349_v18, %v674_v57 }
 0x142   : > { %1717 = vst [vmem:[%s2379_s18 + $0xde0] sm:$0xff] %v1205_v5  ;;  %1718 = vst [vmem:[%s2379_s18 + $0xde8] sm:$0xff] %v1206_v6  ;;  %v1229_v61 = vmul.f32 %v2352_v20, %v675_v58  ;;  %v1230_v62 = vmul.f32 %v2355_v22, %v676_v59  ;;  %v677_v63 = vld [vmem:[%s2329_s4 + $0xeb0] sm:$0xff]  ;;  %v678_v0 = vld [vmem:[%s2329_s4 + $0xeb8] sm:$0xff] }
 0x143   : > { %1719 = vst [vmem:[%s2379_s18 + $0xdf0] sm:$0xff] %v1207_v10  ;;  %1720 = vst [vmem:[%s2379_s18 + $0xdf8] sm:$0xff] %v1208_v11  ;;  %v679_v1 = vld [vmem:[%s2329_s4 + $0xec0] sm:$0xff]  ;;  %v1231_v2 = vmul.f32 %v2358_v24, %v677_v63  ;;  %v1232_v3 = vmul.f32 %v2361_v26, %v678_v0  ;;  %v680_v5 = vld [vmem:[%s2329_s4 + $0xec8] sm:$0xff] }
 0x144   : > { %1721 = vst [vmem:[%s2379_s18 + $0xe00] sm:$0xff] %v1209_v12  ;;  %1722 = vst [vmem:[%s2379_s18 + $0xe08] sm:$0xff] %v1210_v21  ;;  %v1233_v4 = vmul.f32 %v2341_v13, %v679_v1  ;;  %v681_v6 = vld [vmem:[%s2329_s4 + $0xed0] sm:$0xff]  ;;  %v682_v7 = vld [vmem:[%s2329_s4 + $0xed8] sm:$0xff]  ;;  %v1234_v8 = vmul.f32 %v2343_v14, %v680_v5 }
 0x145   : > { %1723 = vst [vmem:[%s2379_s18 + $0xe10] sm:$0xff] %v1211_v23  ;;  %1724 = vst [vmem:[%s2379_s18 + $0xe18] sm:$0xff] %v1212_v25  ;;  %v1235_v9 = vmul.f32 %v2346_v16, %v681_v6  ;;  %v1236_v10 = vmul.f32 %v2349_v18, %v682_v7  ;;  %v683_v11 = vld [vmem:[%s2329_s4 + $0xee0] sm:$0xff]  ;;  %v684_v12 = vld [vmem:[%s2329_s4 + $0xee8] sm:$0xff] }
 0x146   : > { %1725 = vst [vmem:[%s2379_s18 + $0xe20] sm:$0xff] %v1213_v30  ;;  %1726 = vst [vmem:[%s2379_s18 + $0xe28] sm:$0xff] %v1214_v31  ;;  %v685_v15 = vld [vmem:[%s2329_s4 + $0xef0] sm:$0xff]  ;;  %v1237_v17 = vmul.f32 %v2352_v20, %v683_v11  ;;  %v1238_v19 = vmul.f32 %v2355_v22, %v684_v12  ;;  %v686_v23 = vld [vmem:[%s2329_s4 + $0xef8] sm:$0xff] }
 0x147   : > { %1727 = vst [vmem:[%s2379_s18 + $0xe30] sm:$0xff] %v1215_v32  ;;  %1728 = vst [vmem:[%s2379_s18 + $0xe38] sm:$0xff] %v1216_v36  ;;  %v1239_v21 = vmul.f32 %v2358_v24, %v685_v15  ;;  %v687_v25 = vld [vmem:[%s2329_s4 + $0xf00] sm:$0xff]  ;;  %v688_v27 = vld [vmem:[%s2329_s4 + $0xf08] sm:$0xff]  ;;  %v1240_v28 = vmul.f32 %v2361_v26, %v686_v23 }
 0x148   : > { %1729 = vst [vmem:[%s2379_s18 + $0xe40] sm:$0xff] %v1217_v37  ;;  %1730 = vst [vmem:[%s2379_s18 + $0xe48] sm:$0xff] %v1218_v38  ;;  %v1241_v29 = vmul.f32 %v2341_v13, %v687_v25  ;;  %v1242_v30 = vmul.f32 %v2343_v14, %v688_v27  ;;  %v689_v31 = vld [vmem:[%s2329_s4 + $0xf10] sm:$0xff]  ;;  %v690_v32 = vld [vmem:[%s2329_s4 + $0xf18] sm:$0xff] }
 0x149   : > { %1731 = vst [vmem:[%s2379_s18 + $0xe50] sm:$0xff] %v1219_v42  ;;  %1732 = vst [vmem:[%s2379_s18 + $0xe58] sm:$0xff] %v1220_v43  ;;  %v691_v33 = vld [vmem:[%s2329_s4 + $0xf20] sm:$0xff]  ;;  %v1243_v34 = vmul.f32 %v2346_v16, %v689_v31  ;;  %v1244_v35 = vmul.f32 %v2349_v18, %v690_v32  ;;  %v692_v37 = vld [vmem:[%s2329_s4 + $0xf28] sm:$0xff] }
 0x14a   : > { %1733 = vst [vmem:[%s2379_s18 + $0xe60] sm:$0xff] %v1221_v44  ;;  %1734 = vst [vmem:[%s2379_s18 + $0xe68] sm:$0xff] %v1222_v48  ;;  %v1245_v36 = vmul.f32 %v2352_v20, %v691_v33  ;;  %v693_v38 = vld [vmem:[%s2329_s4 + $0xf30] sm:$0xff]  ;;  %v694_v39 = vld [vmem:[%s2329_s4 + $0xf38] sm:$0xff]  ;;  %v1246_v40 = vmul.f32 %v2355_v22, %v692_v37 }
 0x14b   : > { %1735 = vst [vmem:[%s2379_s18 + $0xe70] sm:$0xff] %v1223_v49  ;;  %1736 = vst [vmem:[%s2379_s18 + $0xe78] sm:$0xff] %v1224_v50  ;;  %v1247_v41 = vmul.f32 %v2358_v24, %v693_v38  ;;  %v1248_v42 = vmul.f32 %v2361_v26, %v694_v39  ;;  %v695_v43 = vld [vmem:[%s2329_s4 + $0xf40] sm:$0xff]  ;;  %v696_v44 = vld [vmem:[%s2329_s4 + $0xf48] sm:$0xff] }
 0x14c   : > { %1737 = vst [vmem:[%s2379_s18 + $0xe80] sm:$0xff] %v1225_v54  ;;  %1738 = vst [vmem:[%s2379_s18 + $0xe88] sm:$0xff] %v1226_v55  ;;  %v697_v45 = vld [vmem:[%s2329_s4 + $0xf50] sm:$0xff]  ;;  %v1249_v46 = vmul.f32 %v2341_v13, %v695_v43  ;;  %v1250_v47 = vmul.f32 %v2343_v14, %v696_v44  ;;  %v698_v49 = vld [vmem:[%s2329_s4 + $0xf58] sm:$0xff] }
 0x14d   : > { %1739 = vst [vmem:[%s2379_s18 + $0xe90] sm:$0xff] %v1227_v56  ;;  %1740 = vst [vmem:[%s2379_s18 + $0xe98] sm:$0xff] %v1228_v60  ;;  %v1251_v48 = vmul.f32 %v2346_v16, %v697_v45  ;;  %v699_v50 = vld [vmem:[%s2329_s4 + $0xf60] sm:$0xff]  ;;  %v700_v51 = vld [vmem:[%s2329_s4 + $0xf68] sm:$0xff]  ;;  %v1252_v52 = vmul.f32 %v2349_v18, %v698_v49 }
 0x14e   : > { %1741 = vst [vmem:[%s2379_s18 + $0xea0] sm:$0xff] %v1229_v61  ;;  %1742 = vst [vmem:[%s2379_s18 + $0xea8] sm:$0xff] %v1230_v62  ;;  %v1253_v53 = vmul.f32 %v2352_v20, %v699_v50  ;;  %v1254_v54 = vmul.f32 %v2355_v22, %v700_v51  ;;  %v701_v55 = vld [vmem:[%s2329_s4 + $0xf70] sm:$0xff]  ;;  %v702_v56 = vld [vmem:[%s2329_s4 + $0xf78] sm:$0xff] }
 0x14f   : > { %1743 = vst [vmem:[%s2379_s18 + $0xeb0] sm:$0xff] %v1231_v2  ;;  %1744 = vst [vmem:[%s2379_s18 + $0xeb8] sm:$0xff] %v1232_v3  ;;  %v703_v57 = vld [vmem:[%s2329_s4 + $0xf80] sm:$0xff]  ;;  %v1255_v58 = vmul.f32 %v2358_v24, %v701_v55  ;;  %v1256_v59 = vmul.f32 %v2361_v26, %v702_v56  ;;  %v704_v61 = vld [vmem:[%s2329_s4 + $0xf88] sm:$0xff] }
 0x150   : > { %1745 = vst [vmem:[%s2379_s18 + $0xec0] sm:$0xff] %v1233_v4  ;;  %1746 = vst [vmem:[%s2379_s18 + $0xec8] sm:$0xff] %v1234_v8  ;;  %v1257_v60 = vmul.f32 %v2341_v13, %v703_v57  ;;  %v705_v62 = vld [vmem:[%s2329_s4 + $0xf90] sm:$0xff]  ;;  %v706_v63 = vld [vmem:[%s2329_s4 + $0xf98] sm:$0xff]  ;;  %v1258_v0 = vmul.f32 %v2343_v14, %v704_v61 }
 0x151   : > { %1747 = vst [vmem:[%s2379_s18 + $0xed0] sm:$0xff] %v1235_v9  ;;  %1748 = vst [vmem:[%s2379_s18 + $0xed8] sm:$0xff] %v1236_v10  ;;  %v1259_v1 = vmul.f32 %v2346_v16, %v705_v62  ;;  %v1260_v2 = vmul.f32 %v2349_v18, %v706_v63  ;;  %v707_v3 = vld [vmem:[%s2329_s4 + $0xfa0] sm:$0xff]  ;;  %v708_v4 = vld [vmem:[%s2329_s4 + $0xfa8] sm:$0xff] }
 0x152   : > { %1749 = vst [vmem:[%s2379_s18 + $0xee0] sm:$0xff] %v1237_v17  ;;  %1750 = vst [vmem:[%s2379_s18 + $0xee8] sm:$0xff] %v1238_v19  ;;  %v709_v5 = vld [vmem:[%s2329_s4 + $0xfb0] sm:$0xff]  ;;  %v1261_v6 = vmul.f32 %v2352_v20, %v707_v3  ;;  %v1262_v7 = vmul.f32 %v2355_v22, %v708_v4  ;;  %v710_v9 = vld [vmem:[%s2329_s4 + $0xfb8] sm:$0xff] }
 0x153   : > { %1751 = vst [vmem:[%s2379_s18 + $0xef0] sm:$0xff] %v1239_v21  ;;  %1752 = vst [vmem:[%s2379_s18 + $0xef8] sm:$0xff] %v1240_v28  ;;  %v1263_v8 = vmul.f32 %v2358_v24, %v709_v5  ;;  %v711_v10 = vld [vmem:[%s2329_s4 + $0xfc0] sm:$0xff]  ;;  %v712_v11 = vld [vmem:[%s2329_s4 + $0xfc8] sm:$0xff]  ;;  %v1264_v12 = vmul.f32 %v2361_v26, %v710_v9 }
 0x154   : > { %1753 = vst [vmem:[%s2379_s18 + $0xf00] sm:$0xff] %v1241_v29  ;;  %1754 = vst [vmem:[%s2379_s18 + $0xf08] sm:$0xff] %v1242_v30  ;;  %v1265_v15 = vmul.f32 %v2341_v13, %v711_v10  ;;  %v1266_v17 = vmul.f32 %v2343_v14, %v712_v11  ;;  %v713_v19 = vld [vmem:[%s2329_s4 + $0xfd0] sm:$0xff]  ;;  %v714_v21 = vld [vmem:[%s2329_s4 + $0xfd8] sm:$0xff] }
 0x155   : > { %1755 = vst [vmem:[%s2379_s18 + $0xf10] sm:$0xff] %v1243_v34  ;;  %1756 = vst [vmem:[%s2379_s18 + $0xf18] sm:$0xff] %v1244_v35  ;;  %v715_v23 = vld [vmem:[%s2329_s4 + $0xfe0] sm:$0xff]  ;;  %v1267_v25 = vmul.f32 %v2346_v16, %v713_v19  ;;  %v1268_v27 = vmul.f32 %v2349_v18, %v714_v21  ;;  %v716_v14 = vld [vmem:[%s2329_s4 + $0xfe8] sm:$0xff] }
 0x156   : > { %1757 = vst [vmem:[%s2379_s18 + $0xf20] sm:$0xff] %v1245_v36  ;;  %1758 = vst [vmem:[%s2379_s18 + $0xf28] sm:$0xff] %v1246_v40  ;;  %v1269_v13 = vmul.f32 %v2352_v20, %v715_v23  ;;  %v717_v28 = vld [vmem:[%s2329_s4 + $0xff0] sm:$0xff]  ;;  %v718_v29 = vld [vmem:[%s2329_s4 + $0xff8] sm:$0xff]  ;;  %v1270_v16 = vmul.f32 %v2355_v22, %v716_v14 }
 0x157   : > { %1759 = vst [vmem:[%s2379_s18 + $0xf30] sm:$0xff] %v1247_v41  ;;  %1760 = vst [vmem:[%s2379_s18 + $0xf38] sm:$0xff] %v1248_v42  ;;  %v1271_v18 = vmul.f32 %v2358_v24, %v717_v28  ;;  %v1272_v20 = vmul.f32 %v2361_v26, %v718_v29 }
 0x158   : > { %1761 = vst [vmem:[%s2379_s18 + $0xf40] sm:$0xff] %v1249_v46  ;;  %1762 = vst [vmem:[%s2379_s18 + $0xf48] sm:$0xff] %v1250_v47 }
 0x159   : > { %1763 = vst [vmem:[%s2379_s18 + $0xf50] sm:$0xff] %v1251_v48  ;;  %1764 = vst [vmem:[%s2379_s18 + $0xf58] sm:$0xff] %v1252_v52 }
 0x15a   : > { %1765 = vst [vmem:[%s2379_s18 + $0xf60] sm:$0xff] %v1253_v53  ;;  %1766 = vst [vmem:[%s2379_s18 + $0xf68] sm:$0xff] %v1254_v54 }
 0x15b   : > { %1767 = vst [vmem:[%s2379_s18 + $0xf70] sm:$0xff] %v1255_v58  ;;  %1768 = vst [vmem:[%s2379_s18 + $0xf78] sm:$0xff] %v1256_v59 }
 0x15c   : > { %1769 = vst [vmem:[%s2379_s18 + $0xf80] sm:$0xff] %v1257_v60  ;;  %1770 = vst [vmem:[%s2379_s18 + $0xf88] sm:$0xff] %v1258_v0 }
 0x15d   : > { %1771 = vst [vmem:[%s2379_s18 + $0xf90] sm:$0xff] %v1259_v1  ;;  %1772 = vst [vmem:[%s2379_s18 + $0xf98] sm:$0xff] %v1260_v2 }
 0x15e   : > { %1773 = vst [vmem:[%s2379_s18 + $0xfa0] sm:$0xff] %v1261_v6  ;;  %1774 = vst [vmem:[%s2379_s18 + $0xfa8] sm:$0xff] %v1262_v7 }
 0x15f   : > { %1775 = vst [vmem:[%s2379_s18 + $0xfb0] sm:$0xff] %v1263_v8  ;;  %1776 = vst [vmem:[%s2379_s18 + $0xfb8] sm:$0xff] %v1264_v12 }
 0x160   : > { %1777 = vst [vmem:[%s2379_s18 + $0xfc0] sm:$0xff] %v1265_v15  ;;  %1778 = vst [vmem:[%s2379_s18 + $0xfc8] sm:$0xff] %v1266_v17 }
 0x161   : > { %1779 = vst [vmem:[%s2379_s18 + $0xfd0] sm:$0xff] %v1267_v25  ;;  %1780 = vst [vmem:[%s2379_s18 + $0xfd8] sm:$0xff] %v1268_v27 }
 0x162   : > { %1781 = vst [vmem:[%s2379_s18 + $0xfe0] sm:$0xff] %v1269_v13  ;;  %1782 = vst [vmem:[%s2379_s18 + $0xfe8] sm:$0xff] %v1270_v16 }
 0x163   : > { %1783 = vst [vmem:[%s2379_s18 + $0xff0] sm:$0xff] %v1271_v18  ;;  %1784 = vst [vmem:[%s2379_s18 + $0xff8] sm:$0xff] %v1272_v20 }
 0x164   : > { %2072 = shalt.err (!%p2069_p7)
}
 0x165   : > { %s2073_s27 = scalar_lea.hbm %s3890_s15, 65536  ;;  %s2077_s16 = scalar_lea.hbm %s3957_s2, 131072 }
 0x166   : > { %p2074_p13 = scmp.ne.s32.totalorder %s3890_s15, %s2073_s27  ;;  %p2078_p12 = scmp.lt.u32.totalorder %s3890_s15, %s3957_s2 }
 0x167   : > { %p2079_p4 = scmp.lt.u32.totalorder %s2077_s16, %s2073_s27  ;;  %p2081_p5 = scmp.lt.u32.totalorder %s2073_s27, %s3890_s15 }
 0x168   : > { %p2075_p2 = pnand %p2074_p13, %p3978_p10 }
 0x169   : > { %p2080_p8 = por %p2079_p4, %p2078_p12 }
 0x16a   : > { %p2076_p6 = pneg %p2075_p2 }
 0x16b   : > { %p2082_p11 = por %p2081_p5, %p2080_p8 }
 0x16d   : > { %p2083_p1 = pnand %p2082_p11, %p2076_p6 }
 0x16f   : > { %2086 = shalt.err (!%p2083_p1)
}
 0x170   : > { %s2152_s4 = smov 1024   ;;  %s2153_s18 = smov 64  }
 0x171   : > { %1930 = dma.vmem_to_hbm [thread:$0]  (%p3978_p10), %s3894_s23, 65536, %s3890_s15, %s1786_s12, %s2152_s4, %s2152_s4, %s2153_s18  }
 0x172 PF: > { %s1817_s20 = sand.u32 1, %s2125_s9   ;;  %p3979_p0 = scmp.ne.s32.totalorder %s3968_s22, 0 }
 0x173   : > { %p3980_p9 = scmp.ge.s32.totalorder %s2145_s14, 2  ;;  %s1818_s26 = scalar_lea.sflag [#allocation4], %s1817_s20 }
 0x175   : > { %p1941_p3 = pnand %p3980_p9, %p3979_p0 }
 0x177   : > { %2120 = dma.done.wait (!%p1941_p3), %s1818_s26, 65536  }
 0x178   : > { %2122 = vsyncadd (!%p1941_p3), %s1818_s26, 4294901760  ;;  %s19_s14 = sadd.s32 1, %s2145_s14   ;;  %s3981_s9 = smov %s2129_s10 }
 0x179   : > { %p16_p7 = scmp.ge.s32.totalorder %s19_s14, 4   ;;  %s3982_s10 = smov %s2133_s11 }
 0x17a   : > { %s3983_s11 = smov %s2288_s25  ;;  %s3984_s12 = smov %s2141_s13 }
 0x17b   : > { %s3985_s13 = smov %s3987_s28  ;;  %18 = sbr.rel (!%p16_p7) target bundleno = 7 (0x7), region = 78 }
 0x182   :  { %1823 = vsyncpa [#allocation3], 1 }
 0x183   :  { %1825 = vsyncpa [#allocation3 + $0x1], 1 }
 0x184   :  { %1826 = vsyncpa [#allocation6], 1 }
 0x185   :  { %1827 = vsyncpa [#allocation4], 1 }
 0x186   :  { %1829 = vsyncpa [#allocation4 + $0x1], 1 }

</bundles_post_ra>
